<compile_context>
chip_gen: v5e
topology: v5e:2x2
jax: 0.10.0
libtpu: 0.0.40
codegen_flags: <defaults>
</compile_context>

<pallas_src>
import jax
import jax.numpy as jnp
import numpy as np
from jax.experimental import pallas as pl
from jax.experimental.pallas import tpu as pltpu


def _head_kernel(x_ref,
                 w1_ref, w2_ref, w3_ref, pw2_ref, pw3_ref, fcw_ref, vec_ref,
                 out_ref,
                 xpad, s1, p1pad, s2, p2pad, s3):
    _, L, Cin = x_ref.shape
    C1 = w1_ref.shape[2]
    C2 = w2_ref.shape[2]
    C4 = w3_ref.shape[2]
    nc = fcw_ref.shape[1]
    L1 = (L - 5) // 2 + 1     # MaxPool1d(5, stride=2), no padding
    L2 = (L1 - 5) // 2 + 1
    L3 = (L2 - 5) // 2 + 1

    def conv5(src_pad_ref, w_ref, length, cout):
        # Conv1d(k=5, stride=1, pad=2) with BN scale pre-folded into the weights:
        # 5 shifted (L, Cin) @ (Cin, Cout) MXU matmuls.
        acc = jnp.zeros((length, cout), jnp.float32)
        for k in range(5):
            acc += jnp.dot(src_pad_ref[k:k + length, :], w_ref[k],
                           preferred_element_type=jnp.float32)
        return acc

    def maxpool(src_ref, lout):
        # MaxPool1d(5, stride=2): out[l] = max_k src[2l + k]; strided sublane reads.
        m = src_ref[pl.ds(0, lout, stride=2), :]
        for k in range(1, 5):
            m = jnp.maximum(m, src_ref[pl.ds(k, lout, stride=2), :])
        return m

    def set_halo(pad_ref, length, c):
        # Only the 2 leading + 2 trailing halo rows need clearing each step; the interior
        # [2:length+2] is always overwritten below.
        z = jnp.zeros((2, c), jnp.float32)
        pad_ref[0:2, :] = z
        pad_ref[length + 2:length + 4, :] = z

    # ---- stage 1: conv1 (BN scale folded) + shift + ReLU, maxpool ----
    set_halo(xpad, L, Cin)
    xpad[2:L + 2, :] = x_ref[0]
    s1[...] = jnp.maximum(conv5(xpad, w1_ref, L, C1) + vec_ref[0:1, 0:C1], 0.0)
    p1 = maxpool(s1, L1)                                   # (L1, C1)

    # ---- stage 2: residual = conv2(p1); x = pointconv2(p1) + residual; maxpool ----
    set_halo(p1pad, L1, C1)
    p1pad[2:L1 + 2, :] = p1
    res2 = jnp.maximum(conv5(p1pad, w2_ref, L1, C2) + vec_ref[1:2, 0:C2], 0.0)
    pc2 = jnp.dot(p1, pw2_ref[...], preferred_element_type=jnp.float32) + vec_ref[2:3, 0:C2]
    s2[...] = pc2 + res2
    p2 = maxpool(s2, L2)                                   # (L2, C2)

    # ---- stage 3: residual = conv3(p2); x = pointconv3(p2) + residual; maxpool ----
    set_halo(p2pad, L2, C2)
    p2pad[2:L2 + 2, :] = p2
    res3 = jnp.maximum(conv5(p2pad, w3_ref, L2, C4) + vec_ref[3:4, 0:C4], 0.0)
    pc3 = jnp.dot(p2, pw3_ref[...], preferred_element_type=jnp.float32) + vec_ref[4:5, 0:C4]
    s3[...] = pc3 + res3
    p3 = maxpool(s3, L3)                                   # (L3, C4)

    # ---- GAP -> flatten -> (dropout = identity in eval) -> fused fc @ fc1 ----
    feat = jnp.sum(p3, axis=0, keepdims=True) * (1.0 / L3)  # (1, C4)
    y = jnp.dot(feat, fcw_ref[...], preferred_element_type=jnp.float32) + vec_ref[5:6, 0:nc]
    out_ref[...] = y.reshape(1, 1, -1).astype(out_ref.dtype)


def classification_head(x_ncw, params):
    """x_ncw: (B, Cin, L) float32 (PyTorch NCW). Returns (B, num_classes)."""
    x = jnp.transpose(x_ncw, (0, 2, 1)).astype(jnp.float32)   # (B, L, Cin)
    B, L, Cin = x.shape
    C1 = params["w1"].shape[2]
    C2 = params["w2"].shape[2]
    C4 = params["w3"].shape[2]
    nc = params["fc1b"].shape[-1]
    L1 = (L - 5) // 2 + 1
    L2 = (L1 - 5) // 2 + 1
    f32 = jnp.float32

    # ---- offline constant folding (exact in eval mode) ----
    w1f = (params["w1"] * params["bn1s"][None, :, :]).astype(f32)   # BN scale -> weights
    w2f = (params["w2"] * params["bn2s"][None, :, :]).astype(f32)
    w3f = (params["w3"] * params["bn3s"][None, :, :]).astype(f32)
    fcw_fused = (params["fcw"] @ params["fc1w"]).astype(f32)                      # (C4, nc)
    fcb_fused = (params["fcb"] @ params["fc1w"] + params["fc1b"]).astype(f32)     # (1, nc)

    # ---- pack all small per-channel vectors into a single (6, Cmax) array ----
    cmax = max(C1, C2, C4, nc)

    def row(v):
        v = jnp.asarray(v, f32).reshape(-1)
        return jnp.pad(v, (0, cmax - v.shape[0]))

    vecs = jnp.stack([row(params["bn1b"]), row(params["bn2b"]), row(params["pw2b"]),
                      row(params["bn3b"]), row(params["pw3b"]), row(fcb_fused)], axis=0)

    weights = [w1f, w2f, w3f,
               params["pw2"].astype(f32), params["pw3"].astype(f32),
               fcw_fused, vecs]

    def full_spec(a):
        n = a.ndim
        return pl.BlockSpec(a.shape, lambda b, n=n: (0,) * n)

    in_specs = [pl.BlockSpec((1, L, Cin), lambda b: (b, 0, 0))]
    in_specs += [full_spec(w) for w in weights]
    out_spec = pl.BlockSpec((1, 1, nc), lambda b: (b, 0, 0))

    out = pl.pallas_call(
        _head_kernel,
        out_shape=jax.ShapeDtypeStruct((B, 1, nc), jnp.float32),
        grid_spec=pltpu.PrefetchScalarGridSpec(
            num_scalar_prefetch=0,
            grid=(B,),
            in_specs=in_specs,
            out_specs=out_spec,
            scratch_shapes=[
                pltpu.VMEM((L + 4, Cin), jnp.float32),   # padded conv1 input (halo rows)
                pltpu.VMEM((L, C1), jnp.float32),        # conv1 output (pre-pool)
                pltpu.VMEM((L1 + 4, C1), jnp.float32),   # padded stage-2 input
                pltpu.VMEM((L1, C2), jnp.float32),       # stage-2 output (pre-pool)
                pltpu.VMEM((L2 + 4, C2), jnp.float32),   # padded stage-3 input
                pltpu.VMEM((L2, C4), jnp.float32),       # stage-3 output (pre-pool)
            ],
        ),
        # Samples are independent -> "parallel" lets v7x shard the batch across its 2 TCs;
        # harmless no-op on single-TC v5e/v6e.
        compiler_params=pltpu.CompilerParams(dimension_semantics=("parallel",)),
    )(x, *weights)
    return out[:, 0, :]


def init_params(key, cin, c1, hidden=32, num_classes=2):
    ks = jax.random.split(key, 32)
    it = iter(range(32))
    eps = 1e-5

    def nrm(shape, scale=0.1):
        return scale * jax.random.normal(ks[next(it)], shape, jnp.float32)

    def bn(c):
        gamma = 1.0 + 0.1 * jax.random.normal(ks[next(it)], (c,), jnp.float32)
        beta = 0.1 * jax.random.normal(ks[next(it)], (c,), jnp.float32)
        mean = 0.1 * jax.random.normal(ks[next(it)], (c,), jnp.float32)
        var = jnp.abs(jax.random.normal(ks[next(it)], (c,), jnp.float32)) + 0.5
        scale = gamma / jnp.sqrt(var + eps)
        shift = beta - mean * scale
        return scale[None, :], shift[None, :]

    c2, c4 = 2 * c1, 4 * c1
    p = {}
    p["w1"] = nrm((5, cin, c1))          # conv1 weight, (K, Cin, Cout)
    p["bn1s"], p["bn1b"] = bn(c1)
    p["w2"] = nrm((5, c1, c2))
    p["bn2s"], p["bn2b"] = bn(c2)
    p["pw2"] = nrm((c1, c2))             # pointconv2 (1x1 conv) as matmul
    p["pw2b"] = nrm((1, c2))
    p["w3"] = nrm((5, c2, c4))
    p["bn3s"], p["bn3b"] = bn(c4)
    p["pw3"] = nrm((c2, c4))
    p["pw3b"] = nrm((1, c4))
    p["fcw"] = nrm((c4, hidden))
    p["fcb"] = nrm((1, hidden))
    p["fc1w"] = nrm((hidden, num_classes))
    p["fc1b"] = nrm((1, num_classes))
    return p


def reference(x_ncw, p):
    """Pure-JAX reference of the same forward pass (eval-mode BN/dropout), unfused params."""
    x = jnp.transpose(x_ncw, (0, 2, 1)).astype(jnp.float32)

    def conv5(x, w):
        L = x.shape[1]
        xp = jnp.pad(x, ((0, 0), (2, 2), (0, 0)))
        return sum(jnp.einsum('blc,cd->bld', xp[:, k:k + L, :], w[k]) for k in range(5))

    def bnrelu(x, s, b):
        return jnp.maximum(x * s + b, 0.0)

    def maxpool(x):
        L = x.shape[1]
        Lo = (L - 5) // 2 + 1
        return jnp.max(jnp.stack([x[:, k::2, :][:, :Lo, :] for k in range(5)], 0), 0)

    h = maxpool(bnrelu(conv5(x, p["w1"]), p["bn1s"], p["bn1b"]))
    res = bnrelu(conv5(h, p["w2"]), p["bn2s"], p["bn2b"])
    h = jnp.einsum('blc,cd->bld', h, p["pw2"]) + p["pw2b"][None]
    h = maxpool(h + res)
    res = bnrelu(conv5(h, p["w3"]), p["bn3s"], p["bn3b"])
    h = jnp.einsum('blc,cd->bld', h, p["pw3"]) + p["pw3b"][None]
    h = maxpool(h + res)
    feat = jnp.mean(h, axis=1)
    y = feat @ p["fcw"] + p["fcb"]
    y = y @ p["fc1w"] + p["fc1b"]
    return y


if __name__ == "__main__":
    key = jax.random.PRNGKey(0)
    kx, kp = jax.random.split(key)
    B, Cin, C1, L = 2, 4, 8, 64          # input_channel=4, initial_channel=8
    hidden, num_classes = 32, 2
    x_ncw = jax.random.normal(kx, (B, Cin, L), jnp.float32)   # PyTorch NCW layout
    params = init_params(kp, Cin, C1, hidden, num_classes)

    out = classification_head(x_ncw, params)
    out = jax.block_until_ready(out)

    ref = reference(x_ncw, params)
    np.testing.assert_allclose(np.asarray(out), np.asarray(ref), rtol=1e-4, atol=1e-4)
    print("KERNEL_OK")
</pallas_src>

<mosaic_0001>
module attributes {stable_mosaic.version = 11 : i64} {
  func.func @_head_kernel(%arg0: i32, %arg1: memref<1x64x4xf32, #tpu.memory_space<vmem>>, %arg2: memref<5x4x8xf32, #tpu.memory_space<vmem>>, %arg3: memref<5x8x16xf32, #tpu.memory_space<vmem>>, %arg4: memref<5x16x32xf32, #tpu.memory_space<vmem>>, %arg5: memref<8x16xf32, #tpu.memory_space<vmem>>, %arg6: memref<16x32xf32, #tpu.memory_space<vmem>>, %arg7: memref<32x2xf32, #tpu.memory_space<vmem>>, %arg8: memref<6x32xf32, #tpu.memory_space<vmem>>, %arg9: memref<1x1x2xf32, #tpu.memory_space<vmem>>, %arg10: memref<68x4xf32, #tpu.memory_space<vmem>>, %arg11: memref<64x8xf32, #tpu.memory_space<vmem>>, %arg12: memref<34x8xf32, #tpu.memory_space<vmem>>, %arg13: memref<30x16xf32, #tpu.memory_space<vmem>>, %arg14: memref<17x16xf32, #tpu.memory_space<vmem>>, %arg15: memref<13x32xf32, #tpu.memory_space<vmem>>) attributes {dimension_semantics = [#tpu.dimension_semantics<parallel>], iteration_bounds = array<i64: 2>, scalar_prefetch = 0 : i64, scratch_operands = 6 : i64, tpu.core_type = #tpu.core_type<tc>, window_params = [{transform_indices = @transform_0, window_bounds = array<i64: 1, 64, 4>}, {pipeline_mode = #tpu.pipeline_mode<synchronous>, transform_indices = @transform_1, window_bounds = array<i64: 5, 4, 8>}, {pipeline_mode = #tpu.pipeline_mode<synchronous>, transform_indices = @transform_2, window_bounds = array<i64: 5, 8, 16>}, {pipeline_mode = #tpu.pipeline_mode<synchronous>, transform_indices = @transform_3, window_bounds = array<i64: 5, 16, 32>}, {pipeline_mode = #tpu.pipeline_mode<synchronous>, transform_indices = @transform_4, window_bounds = array<i64: 8, 16>}, {pipeline_mode = #tpu.pipeline_mode<synchronous>, transform_indices = @transform_5, window_bounds = array<i64: 16, 32>}, {pipeline_mode = #tpu.pipeline_mode<synchronous>, transform_indices = @transform_6, window_bounds = array<i64: 32, 2>}, {pipeline_mode = #tpu.pipeline_mode<synchronous>, transform_indices = @transform_7, window_bounds = array<i64: 6, 32>}, {transform_indices = @transform_8, window_bounds = array<i64: 1, 1, 2>}]} {
    %cst = arith.constant 0.000000e+00 : f32
    %0 = vector.broadcast %cst : f32 to vector<2x4xf32>
    %c0 = arith.constant 0 : index
    %c0_0 = arith.constant 0 : index
    %1 = vector.load %arg10[%c0, %c0_0] : memref<68x4xf32, #tpu.memory_space<vmem>>, vector<2x4xf32>
    tpu.vector_store %arg10[%c0, %c0_0], %0 {strides = array<i32>} : memref<68x4xf32, #tpu.memory_space<vmem>>, vector<2x4xf32>,
    %c66 = arith.constant 66 : index
    %c0_1 = arith.constant 0 : index
    %2 = vector.load %arg10[%c66, %c0_1] : memref<68x4xf32, #tpu.memory_space<vmem>>, vector<2x4xf32>
    tpu.vector_store %arg10[%c66, %c0_1], %0 {strides = array<i32>} : memref<68x4xf32, #tpu.memory_space<vmem>>, vector<2x4xf32>,
    %c0_2 = arith.constant 0 : index
    %c0_3 = arith.constant 0 : index
    %c0_4 = arith.constant 0 : index
    %3 = vector.load %arg1[%c0_2, %c0_3, %c0_4] : memref<1x64x4xf32, #tpu.memory_space<vmem>>, vector<1x64x4xf32>
    %4 = vector.shape_cast %3 : vector<1x64x4xf32> to vector<64x4xf32>
    %c2 = arith.constant 2 : index
    %c0_5 = arith.constant 0 : index
    %5 = vector.load %arg10[%c2, %c0_5] : memref<68x4xf32, #tpu.memory_space<vmem>>, vector<64x4xf32>
    tpu.vector_store %arg10[%c2, %c0_5], %4 {strides = array<i32>} : memref<68x4xf32, #tpu.memory_space<vmem>>, vector<64x4xf32>,
    %cst_6 = arith.constant 0.000000e+00 : f32
    %6 = vector.broadcast %cst_6 : f32 to vector<64x8xf32>
    %c0_7 = arith.constant 0 : index
    %c0_8 = arith.constant 0 : index
    %7 = vector.load %arg10[%c0_7, %c0_8] : memref<68x4xf32, #tpu.memory_space<vmem>>, vector<64x4xf32>
    %c0_9 = arith.constant 0 : index
    %c0_10 = arith.constant 0 : index
    %c0_11 = arith.constant 0 : index
    %8 = vector.load %arg2[%c0_9, %c0_10, %c0_11] : memref<5x4x8xf32, #tpu.memory_space<vmem>>, vector<1x4x8xf32>
    %9 = vector.shape_cast %8 : vector<1x4x8xf32> to vector<4x8xf32>
    %cst_12 = arith.constant dense<0.000000e+00> : vector<64x8xf32>
    %10 = tpu.matmul %7, %9, %cst_12 {dimension_numbers = #tpu.dot_dimension_numbers<[1], [0], [0], [1], [0, 0, 1, 1], [], []>} : vector<64x4xf32>, vector<4x8xf32>, vector<64x8xf32> -> vector<64x8xf32>
    %11 = arith.addf %6, %10 : vector<64x8xf32>
    %c1 = arith.constant 1 : index
    %c0_13 = arith.constant 0 : index
    %12 = vector.load %arg10[%c1, %c0_13] : memref<68x4xf32, #tpu.memory_space<vmem>>, vector<64x4xf32>
    %c1_14 = arith.constant 1 : index
    %c0_15 = arith.constant 0 : index
    %c0_16 = arith.constant 0 : index
    %13 = vector.load %arg2[%c1_14, %c0_15, %c0_16] : memref<5x4x8xf32, #tpu.memory_space<vmem>>, vector<1x4x8xf32>
    %14 = vector.shape_cast %13 : vector<1x4x8xf32> to vector<4x8xf32>
    %cst_17 = arith.constant dense<0.000000e+00> : vector<64x8xf32>
    %15 = tpu.matmul %12, %14, %cst_17 {dimension_numbers = #tpu.dot_dimension_numbers<[1], [0], [0], [1], [0, 0, 1, 1], [], []>} : vector<64x4xf32>, vector<4x8xf32>, vector<64x8xf32> -> vector<64x8xf32>
    %16 = arith.addf %11, %15 : vector<64x8xf32>
    %c2_18 = arith.constant 2 : index
    %c0_19 = arith.constant 0 : index
    %17 = vector.load %arg10[%c2_18, %c0_19] : memref<68x4xf32, #tpu.memory_space<vmem>>, vector<64x4xf32>
    %c2_20 = arith.constant 2 : index
    %c0_21 = arith.constant 0 : index
    %c0_22 = arith.constant 0 : index
    %18 = vector.load %arg2[%c2_20, %c0_21, %c0_22] : memref<5x4x8xf32, #tpu.memory_space<vmem>>, vector<1x4x8xf32>
    %19 = vector.shape_cast %18 : vector<1x4x8xf32> to vector<4x8xf32>
    %cst_23 = arith.constant dense<0.000000e+00> : vector<64x8xf32>
    %20 = tpu.matmul %17, %19, %cst_23 {dimension_numbers = #tpu.dot_dimension_numbers<[1], [0], [0], [1], [0, 0, 1, 1], [], []>} : vector<64x4xf32>, vector<4x8xf32>, vector<64x8xf32> -> vector<64x8xf32>
    %21 = arith.addf %16, %20 : vector<64x8xf32>
    %c3 = arith.constant 3 : index
    %c0_24 = arith.constant 0 : index
    %22 = vector.load %arg10[%c3, %c0_24] : memref<68x4xf32, #tpu.memory_space<vmem>>, vector<64x4xf32>
    %c3_25 = arith.constant 3 : index
    %c0_26 = arith.constant 0 : index
    %c0_27 = arith.constant 0 : index
    %23 = vector.load %arg2[%c3_25, %c0_26, %c0_27] : memref<5x4x8xf32, #tpu.memory_space<vmem>>, vector<1x4x8xf32>
    %24 = vector.shape_cast %23 : vector<1x4x8xf32> to vector<4x8xf32>
    %cst_28 = arith.constant dense<0.000000e+00> : vector<64x8xf32>
    %25 = tpu.matmul %22, %24, %cst_28 {dimension_numbers = #tpu.dot_dimension_numbers<[1], [0], [0], [1], [0, 0, 1, 1], [], []>} : vector<64x4xf32>, vector<4x8xf32>, vector<64x8xf32> -> vector<64x8xf32>
    %26 = arith.addf %21, %25 : vector<64x8xf32>
    %c4 = arith.constant 4 : index
    %c0_29 = arith.constant 0 : index
    %27 = vector.load %arg10[%c4, %c0_29] : memref<68x4xf32, #tpu.memory_space<vmem>>, vector<64x4xf32>
    %c4_30 = arith.constant 4 : index
    %c0_31 = arith.constant 0 : index
    %c0_32 = arith.constant 0 : index
    %28 = vector.load %arg2[%c4_30, %c0_31, %c0_32] : memref<5x4x8xf32, #tpu.memory_space<vmem>>, vector<1x4x8xf32>
    %29 = vector.shape_cast %28 : vector<1x4x8xf32> to vector<4x8xf32>
    %cst_33 = arith.constant dense<0.000000e+00> : vector<64x8xf32>
    %30 = tpu.matmul %27, %29, %cst_33 {dimension_numbers = #tpu.dot_dimension_numbers<[1], [0], [0], [1], [0, 0, 1, 1], [], []>} : vector<64x4xf32>, vector<4x8xf32>, vector<64x8xf32> -> vector<64x8xf32>
    %31 = arith.addf %26, %30 : vector<64x8xf32>
    %c0_34 = arith.constant 0 : index
    %c0_35 = arith.constant 0 : index
    %32 = vector.load %arg8[%c0_34, %c0_35] : memref<6x32xf32, #tpu.memory_space<vmem>>, vector<1x8xf32>
    %33 = vector.broadcast %32 : vector<1x8xf32> to vector<64x8xf32>
    %34 = arith.addf %31, %33 : vector<64x8xf32>
    %cst_36 = arith.constant 0.000000e+00 : f32
    %35 = vector.broadcast %cst_36 : f32 to vector<64x8xf32>
    %36 = arith.maximumf %34, %35 : vector<64x8xf32>
    %c0_37 = arith.constant 0 : index
    %c0_38 = arith.constant 0 : index
    %37 = vector.load %arg11[%c0_37, %c0_38] : memref<64x8xf32, #tpu.memory_space<vmem>>, vector<64x8xf32>
    tpu.vector_store %arg11[%c0_37, %c0_38], %36 {strides = array<i32>} : memref<64x8xf32, #tpu.memory_space<vmem>>, vector<64x8xf32>,
    %c0_39 = arith.constant 0 : index
    %c0_40 = arith.constant 0 : index
    %38 = tpu.strided_load %arg11[%c0_39, %c0_40] {strides = array<i32: 2, 1>} : memref<64x8xf32, #tpu.memory_space<vmem>>, vector<30x8xf32>
    %c1_41 = arith.constant 1 : index
    %c0_42 = arith.constant 0 : index
    %39 = tpu.strided_load %arg11[%c1_41, %c0_42] {strides = array<i32: 2, 1>} : memref<64x8xf32, #tpu.memory_space<vmem>>, vector<30x8xf32>
    %40 = arith.maximumf %38, %39 : vector<30x8xf32>
    %c2_43 = arith.constant 2 : index
    %c0_44 = arith.constant 0 : index
    %41 = tpu.strided_load %arg11[%c2_43, %c0_44] {strides = array<i32: 2, 1>} : memref<64x8xf32, #tpu.memory_space<vmem>>, vector<30x8xf32>
    %42 = arith.maximumf %40, %41 : vector<30x8xf32>
    %c3_45 = arith.constant 3 : index
    %c0_46 = arith.constant 0 : index
    %43 = tpu.strided_load %arg11[%c3_45, %c0_46] {strides = array<i32: 2, 1>} : memref<64x8xf32, #tpu.memory_space<vmem>>, vector<30x8xf32>
    %44 = arith.maximumf %42, %43 : vector<30x8xf32>
    %c4_47 = arith.constant 4 : index
    %c0_48 = arith.constant 0 : index
    %45 = tpu.strided_load %arg11[%c4_47, %c0_48] {strides = array<i32: 2, 1>} : memref<64x8xf32, #tpu.memory_space<vmem>>, vector<30x8xf32>
    %46 = arith.maximumf %44, %45 : vector<30x8xf32>
    %cst_49 = arith.constant 0.000000e+00 : f32
    %47 = vector.broadcast %cst_49 : f32 to vector<2x8xf32>
    %c0_50 = arith.constant 0 : index
    %c0_51 = arith.constant 0 : index
    %48 = vector.load %arg12[%c0_50, %c0_51] : memref<34x8xf32, #tpu.memory_space<vmem>>, vector<2x8xf32>
    tpu.vector_store %arg12[%c0_50, %c0_51], %47 {strides = array<i32>} : memref<34x8xf32, #tpu.memory_space<vmem>>, vector<2x8xf32>,
    %c32 = arith.constant 32 : index
    %c0_52 = arith.constant 0 : index
    %49 = vector.load %arg12[%c32, %c0_52] : memref<34x8xf32, #tpu.memory_space<vmem>>, vector<2x8xf32>
    tpu.vector_store %arg12[%c32, %c0_52], %47 {strides = array<i32>} : memref<34x8xf32, #tpu.memory_space<vmem>>, vector<2x8xf32>,
    %c2_53 = arith.constant 2 : index
    %c0_54 = arith.constant 0 : index
    %50 = vector.load %arg12[%c2_53, %c0_54] : memref<34x8xf32, #tpu.memory_space<vmem>>, vector<30x8xf32>
    tpu.vector_store %arg12[%c2_53, %c0_54], %46 {strides = array<i32>} : memref<34x8xf32, #tpu.memory_space<vmem>>, vector<30x8xf32>,
    %cst_55 = arith.constant 0.000000e+00 : f32
    %51 = vector.broadcast %cst_55 : f32 to vector<30x16xf32>
    %c0_56 = arith.constant 0 : index
    %c0_57 = arith.constant 0 : index
    %52 = vector.load %arg12[%c0_56, %c0_57] : memref<34x8xf32, #tpu.memory_space<vmem>>, vector<30x8xf32>
    %c0_58 = arith.constant 0 : index
    %c0_59 = arith.constant 0 : index
    %c0_60 = arith.constant 0 : index
    %53 = vector.load %arg3[%c0_58, %c0_59, %c0_60] : memref<5x8x16xf32, #tpu.memory_space<vmem>>, vector<1x8x16xf32>
    %54 = vector.shape_cast %53 : vector<1x8x16xf32> to vector<8x16xf32>
    %cst_61 = arith.constant dense<0.000000e+00> : vector<30x16xf32>
    %55 = tpu.matmul %52, %54, %cst_61 {dimension_numbers = #tpu.dot_dimension_numbers<[1], [0], [0], [1], [0, 0, 1, 1], [], []>} : vector<30x8xf32>, vector<8x16xf32>, vector<30x16xf32> -> vector<30x16xf32>
    %56 = arith.addf %51, %55 : vector<30x16xf32>
    %c1_62 = arith.constant 1 : index
    %c0_63 = arith.constant 0 : index
    %57 = vector.load %arg12[%c1_62, %c0_63] : memref<34x8xf32, #tpu.memory_space<vmem>>, vector<30x8xf32>
    %c1_64 = arith.constant 1 : index
    %c0_65 = arith.constant 0 : index
    %c0_66 = arith.constant 0 : index
    %58 = vector.load %arg3[%c1_64, %c0_65, %c0_66] : memref<5x8x16xf32, #tpu.memory_space<vmem>>, vector<1x8x16xf32>
    %59 = vector.shape_cast %58 : vector<1x8x16xf32> to vector<8x16xf32>
    %cst_67 = arith.constant dense<0.000000e+00> : vector<30x16xf32>
    %60 = tpu.matmul %57, %59, %cst_67 {dimension_numbers = #tpu.dot_dimension_numbers<[1], [0], [0], [1], [0, 0, 1, 1], [], []>} : vector<30x8xf32>, vector<8x16xf32>, vector<30x16xf32> -> vector<30x16xf32>
    %61 = arith.addf %56, %60 : vector<30x16xf32>
    %c2_68 = arith.constant 2 : index
    %c0_69 = arith.constant 0 : index
    %62 = vector.load %arg12[%c2_68, %c0_69] : memref<34x8xf32, #tpu.memory_space<vmem>>, vector<30x8xf32>
    %c2_70 = arith.constant 2 : index
    %c0_71 = arith.constant 0 : index
    %c0_72 = arith.constant 0 : index
    %63 = vector.load %arg3[%c2_70, %c0_71, %c0_72] : memref<5x8x16xf32, #tpu.memory_space<vmem>>, vector<1x8x16xf32>
    %64 = vector.shape_cast %63 : vector<1x8x16xf32> to vector<8x16xf32>
    %cst_73 = arith.constant dense<0.000000e+00> : vector<30x16xf32>
    %65 = tpu.matmul %62, %64, %cst_73 {dimension_numbers = #tpu.dot_dimension_numbers<[1], [0], [0], [1], [0, 0, 1, 1], [], []>} : vector<30x8xf32>, vector<8x16xf32>, vector<30x16xf32> -> vector<30x16xf32>
    %66 = arith.addf %61, %65 : vector<30x16xf32>
    %c3_74 = arith.constant 3 : index
    %c0_75 = arith.constant 0 : index
    %67 = vector.load %arg12[%c3_74, %c0_75] : memref<34x8xf32, #tpu.memory_space<vmem>>, vector<30x8xf32>
    %c3_76 = arith.constant 3 : index
    %c0_77 = arith.constant 0 : index
    %c0_78 = arith.constant 0 : index
    %68 = vector.load %arg3[%c3_76, %c0_77, %c0_78] : memref<5x8x16xf32, #tpu.memory_space<vmem>>, vector<1x8x16xf32>
    %69 = vector.shape_cast %68 : vector<1x8x16xf32> to vector<8x16xf32>
    %cst_79 = arith.constant dense<0.000000e+00> : vector<30x16xf32>
    %70 = tpu.matmul %67, %69, %cst_79 {dimension_numbers = #tpu.dot_dimension_numbers<[1], [0], [0], [1], [0, 0, 1, 1], [], []>} : vector<30x8xf32>, vector<8x16xf32>, vector<30x16xf32> -> vector<30x16xf32>
    %71 = arith.addf %66, %70 : vector<30x16xf32>
    %c4_80 = arith.constant 4 : index
    %c0_81 = arith.constant 0 : index
    %72 = vector.load %arg12[%c4_80, %c0_81] : memref<34x8xf32, #tpu.memory_space<vmem>>, vector<30x8xf32>
    %c4_82 = arith.constant 4 : index
    %c0_83 = arith.constant 0 : index
    %c0_84 = arith.constant 0 : index
    %73 = vector.load %arg3[%c4_82, %c0_83, %c0_84] : memref<5x8x16xf32, #tpu.memory_space<vmem>>, vector<1x8x16xf32>
    %74 = vector.shape_cast %73 : vector<1x8x16xf32> to vector<8x16xf32>
    %cst_85 = arith.constant dense<0.000000e+00> : vector<30x16xf32>
    %75 = tpu.matmul %72, %74, %cst_85 {dimension_numbers = #tpu.dot_dimension_numbers<[1], [0], [0], [1], [0, 0, 1, 1], [], []>} : vector<30x8xf32>, vector<8x16xf32>, vector<30x16xf32> -> vector<30x16xf32>
    %76 = arith.addf %71, %75 : vector<30x16xf32>
    %c1_86 = arith.constant 1 : index
    %c0_87 = arith.constant 0 : index
    %77 = vector.load %arg8[%c1_86, %c0_87] : memref<6x32xf32, #tpu.memory_space<vmem>>, vector<1x16xf32>
    %78 = vector.broadcast %77 : vector<1x16xf32> to vector<30x16xf32>
    %79 = arith.addf %76, %78 : vector<30x16xf32>
    %cst_88 = arith.constant 0.000000e+00 : f32
    %80 = vector.broadcast %cst_88 : f32 to vector<30x16xf32>
    %81 = arith.maximumf %79, %80 : vector<30x16xf32>
    %c0_89 = arith.constant 0 : index
    %c0_90 = arith.constant 0 : index
    %82 = vector.load %arg5[%c0_89, %c0_90] : memref<8x16xf32, #tpu.memory_space<vmem>>, vector<8x16xf32>
    %cst_91 = arith.constant dense<0.000000e+00> : vector<30x16xf32>
    %83 = tpu.matmul %46, %82, %cst_91 {dimension_numbers = #tpu.dot_dimension_numbers<[1], [0], [0], [1], [0, 0, 1, 1], [], []>} : vector<30x8xf32>, vector<8x16xf32>, vector<30x16xf32> -> vector<30x16xf32>
    %c2_92 = arith.constant 2 : index
    %c0_93 = arith.constant 0 : index
    %84 = vector.load %arg8[%c2_92, %c0_93] : memref<6x32xf32, #tpu.memory_space<vmem>>, vector<1x16xf32>
    %85 = vector.broadcast %84 : vector<1x16xf32> to vector<30x16xf32>
    %86 = arith.addf %83, %85 : vector<30x16xf32>
    %87 = arith.addf %86, %81 : vector<30x16xf32>
    %c0_94 = arith.constant 0 : index
    %c0_95 = arith.constant 0 : index
    %88 = vector.load %arg13[%c0_94, %c0_95] : memref<30x16xf32, #tpu.memory_space<vmem>>, vector<30x16xf32>
    tpu.vector_store %arg13[%c0_94, %c0_95], %87 {strides = array<i32>} : memref<30x16xf32, #tpu.memory_space<vmem>>, vector<30x16xf32>,
    %c0_96 = arith.constant 0 : index
    %c0_97 = arith.constant 0 : index
    %89 = tpu.strided_load %arg13[%c0_96, %c0_97] {strides = array<i32: 2, 1>} : memref<30x16xf32, #tpu.memory_space<vmem>>, vector<13x16xf32>
    %c1_98 = arith.constant 1 : index
    %c0_99 = arith.constant 0 : index
    %90 = tpu.strided_load %arg13[%c1_98, %c0_99] {strides = array<i32: 2, 1>} : memref<30x16xf32, #tpu.memory_space<vmem>>, vector<13x16xf32>
    %91 = arith.maximumf %89, %90 : vector<13x16xf32>
    %c2_100 = arith.constant 2 : index
    %c0_101 = arith.constant 0 : index
    %92 = tpu.strided_load %arg13[%c2_100, %c0_101] {strides = array<i32: 2, 1>} : memref<30x16xf32, #tpu.memory_space<vmem>>, vector<13x16xf32>
    %93 = arith.maximumf %91, %92 : vector<13x16xf32>
    %c3_102 = arith.constant 3 : index
    %c0_103 = arith.constant 0 : index
    %94 = tpu.strided_load %arg13[%c3_102, %c0_103] {strides = array<i32: 2, 1>} : memref<30x16xf32, #tpu.memory_space<vmem>>, vector<13x16xf32>
    %95 = arith.maximumf %93, %94 : vector<13x16xf32>
    %c4_104 = arith.constant 4 : index
    %c0_105 = arith.constant 0 : index
    %96 = tpu.strided_load %arg13[%c4_104, %c0_105] {strides = array<i32: 2, 1>} : memref<30x16xf32, #tpu.memory_space<vmem>>, vector<13x16xf32>
    %97 = arith.maximumf %95, %96 : vector<13x16xf32>
    %cst_106 = arith.constant 0.000000e+00 : f32
    %98 = vector.broadcast %cst_106 : f32 to vector<2x16xf32>
    %c0_107 = arith.constant 0 : index
    %c0_108 = arith.constant 0 : index
    %99 = vector.load %arg14[%c0_107, %c0_108] : memref<17x16xf32, #tpu.memory_space<vmem>>, vector<2x16xf32>
    tpu.vector_store %arg14[%c0_107, %c0_108], %98 {strides = array<i32>} : memref<17x16xf32, #tpu.memory_space<vmem>>, vector<2x16xf32>,
    %c15 = arith.constant 15 : index
    %c0_109 = arith.constant 0 : index
    %100 = vector.load %arg14[%c15, %c0_109] : memref<17x16xf32, #tpu.memory_space<vmem>>, vector<2x16xf32>
    tpu.vector_store %arg14[%c15, %c0_109], %98 {strides = array<i32>} : memref<17x16xf32, #tpu.memory_space<vmem>>, vector<2x16xf32>,
    %c2_110 = arith.constant 2 : index
    %c0_111 = arith.constant 0 : index
    %101 = vector.load %arg14[%c2_110, %c0_111] : memref<17x16xf32, #tpu.memory_space<vmem>>, vector<13x16xf32>
    tpu.vector_store %arg14[%c2_110, %c0_111], %97 {strides = array<i32>} : memref<17x16xf32, #tpu.memory_space<vmem>>, vector<13x16xf32>,
    %cst_112 = arith.constant 0.000000e+00 : f32
    %102 = vector.broadcast %cst_112 : f32 to vector<13x32xf32>
    %c0_113 = arith.constant 0 : index
    %c0_114 = arith.constant 0 : index
    %103 = vector.load %arg14[%c0_113, %c0_114] : memref<17x16xf32, #tpu.memory_space<vmem>>, vector<13x16xf32>
    %c0_115 = arith.constant 0 : index
    %c0_116 = arith.constant 0 : index
    %c0_117 = arith.constant 0 : index
    %104 = vector.load %arg4[%c0_115, %c0_116, %c0_117] : memref<5x16x32xf32, #tpu.memory_space<vmem>>, vector<1x16x32xf32>
    %105 = vector.shape_cast %104 : vector<1x16x32xf32> to vector<16x32xf32>
    %cst_118 = arith.constant dense<0.000000e+00> : vector<13x32xf32>
    %106 = tpu.matmul %103, %105, %cst_118 {dimension_numbers = #tpu.dot_dimension_numbers<[1], [0], [0], [1], [0, 0, 1, 1], [], []>} : vector<13x16xf32>, vector<16x32xf32>, vector<13x32xf32> -> vector<13x32xf32>
    %107 = arith.addf %102, %106 : vector<13x32xf32>
    %c1_119 = arith.constant 1 : index
    %c0_120 = arith.constant 0 : index
    %108 = vector.load %arg14[%c1_119, %c0_120] : memref<17x16xf32, #tpu.memory_space<vmem>>, vector<13x16xf32>
    %c1_121 = arith.constant 1 : index
    %c0_122 = arith.constant 0 : index
    %c0_123 = arith.constant 0 : index
    %109 = vector.load %arg4[%c1_121, %c0_122, %c0_123] : memref<5x16x32xf32, #tpu.memory_space<vmem>>, vector<1x16x32xf32>
    %110 = vector.shape_cast %109 : vector<1x16x32xf32> to vector<16x32xf32>
    %cst_124 = arith.constant dense<0.000000e+00> : vector<13x32xf32>
    %111 = tpu.matmul %108, %110, %cst_124 {dimension_numbers = #tpu.dot_dimension_numbers<[1], [0], [0], [1], [0, 0, 1, 1], [], []>} : vector<13x16xf32>, vector<16x32xf32>, vector<13x32xf32> -> vector<13x32xf32>
    %112 = arith.addf %107, %111 : vector<13x32xf32>
    %c2_125 = arith.constant 2 : index
    %c0_126 = arith.constant 0 : index
    %113 = vector.load %arg14[%c2_125, %c0_126] : memref<17x16xf32, #tpu.memory_space<vmem>>, vector<13x16xf32>
    %c2_127 = arith.constant 2 : index
    %c0_128 = arith.constant 0 : index
    %c0_129 = arith.constant 0 : index
    %114 = vector.load %arg4[%c2_127, %c0_128, %c0_129] : memref<5x16x32xf32, #tpu.memory_space<vmem>>, vector<1x16x32xf32>
    %115 = vector.shape_cast %114 : vector<1x16x32xf32> to vector<16x32xf32>
    %cst_130 = arith.constant dense<0.000000e+00> : vector<13x32xf32>
    %116 = tpu.matmul %113, %115, %cst_130 {dimension_numbers = #tpu.dot_dimension_numbers<[1], [0], [0], [1], [0, 0, 1, 1], [], []>} : vector<13x16xf32>, vector<16x32xf32>, vector<13x32xf32> -> vector<13x32xf32>
    %117 = arith.addf %112, %116 : vector<13x32xf32>
    %c3_131 = arith.constant 3 : index
    %c0_132 = arith.constant 0 : index
    %118 = vector.load %arg14[%c3_131, %c0_132] : memref<17x16xf32, #tpu.memory_space<vmem>>, vector<13x16xf32>
    %c3_133 = arith.constant 3 : index
    %c0_134 = arith.constant 0 : index
    %c0_135 = arith.constant 0 : index
    %119 = vector.load %arg4[%c3_133, %c0_134, %c0_135] : memref<5x16x32xf32, #tpu.memory_space<vmem>>, vector<1x16x32xf32>
    %120 = vector.shape_cast %119 : vector<1x16x32xf32> to vector<16x32xf32>
    %cst_136 = arith.constant dense<0.000000e+00> : vector<13x32xf32>
    %121 = tpu.matmul %118, %120, %cst_136 {dimension_numbers = #tpu.dot_dimension_numbers<[1], [0], [0], [1], [0, 0, 1, 1], [], []>} : vector<13x16xf32>, vector<16x32xf32>, vector<13x32xf32> -> vector<13x32xf32>
    %122 = arith.addf %117, %121 : vector<13x32xf32>
    %c4_137 = arith.constant 4 : index
    %c0_138 = arith.constant 0 : index
    %123 = vector.load %arg14[%c4_137, %c0_138] : memref<17x16xf32, #tpu.memory_space<vmem>>, vector<13x16xf32>
    %c4_139 = arith.constant 4 : index
    %c0_140 = arith.constant 0 : index
    %c0_141 = arith.constant 0 : index
    %124 = vector.load %arg4[%c4_139, %c0_140, %c0_141] : memref<5x16x32xf32, #tpu.memory_space<vmem>>, vector<1x16x32xf32>
    %125 = vector.shape_cast %124 : vector<1x16x32xf32> to vector<16x32xf32>
    %cst_142 = arith.constant dense<0.000000e+00> : vector<13x32xf32>
    %126 = tpu.matmul %123, %125, %cst_142 {dimension_numbers = #tpu.dot_dimension_numbers<[1], [0], [0], [1], [0, 0, 1, 1], [], []>} : vector<13x16xf32>, vector<16x32xf32>, vector<13x32xf32> -> vector<13x32xf32>
    %127 = arith.addf %122, %126 : vector<13x32xf32>
    %c3_143 = arith.constant 3 : index
    %c0_144 = arith.constant 0 : index
    %128 = vector.load %arg8[%c3_143, %c0_144] : memref<6x32xf32, #tpu.memory_space<vmem>>, vector<1x32xf32>
    %129 = vector.broadcast %128 : vector<1x32xf32> to vector<13x32xf32>
    %130 = arith.addf %127, %129 : vector<13x32xf32>
    %cst_145 = arith.constant 0.000000e+00 : f32
    %131 = vector.broadcast %cst_145 : f32 to vector<13x32xf32>
    %132 = arith.maximumf %130, %131 : vector<13x32xf32>
    %c0_146 = arith.constant 0 : index
    %c0_147 = arith.constant 0 : index
    %133 = vector.load %arg6[%c0_146, %c0_147] : memref<16x32xf32, #tpu.memory_space<vmem>>, vector<16x32xf32>
    %cst_148 = arith.constant dense<0.000000e+00> : vector<13x32xf32>
    %134 = tpu.matmul %97, %133, %cst_148 {dimension_numbers = #tpu.dot_dimension_numbers<[1], [0], [0], [1], [0, 0, 1, 1], [], []>} : vector<13x16xf32>, vector<16x32xf32>, vector<13x32xf32> -> vector<13x32xf32>
    %c4_149 = arith.constant 4 : index
    %c0_150 = arith.constant 0 : index
    %135 = vector.load %arg8[%c4_149, %c0_150] : memref<6x32xf32, #tpu.memory_space<vmem>>, vector<1x32xf32>
    %136 = vector.broadcast %135 : vector<1x32xf32> to vector<13x32xf32>
    %137 = arith.addf %134, %136 : vector<13x32xf32>
    %138 = arith.addf %137, %132 : vector<13x32xf32>
    %c0_151 = arith.constant 0 : index
    %c0_152 = arith.constant 0 : index
    %139 = vector.load %arg15[%c0_151, %c0_152] : memref<13x32xf32, #tpu.memory_space<vmem>>, vector<13x32xf32>
    tpu.vector_store %arg15[%c0_151, %c0_152], %138 {strides = array<i32>} : memref<13x32xf32, #tpu.memory_space<vmem>>, vector<13x32xf32>,
    %c0_153 = arith.constant 0 : index
    %c0_154 = arith.constant 0 : index
    %140 = tpu.strided_load %arg15[%c0_153, %c0_154] {strides = array<i32: 2, 1>} : memref<13x32xf32, #tpu.memory_space<vmem>>, vector<5x32xf32>
    %c1_155 = arith.constant 1 : index
    %c0_156 = arith.constant 0 : index
    %141 = tpu.strided_load %arg15[%c1_155, %c0_156] {strides = array<i32: 2, 1>} : memref<13x32xf32, #tpu.memory_space<vmem>>, vector<5x32xf32>
    %142 = arith.maximumf %140, %141 : vector<5x32xf32>
    %c2_157 = arith.constant 2 : index
    %c0_158 = arith.constant 0 : index
    %143 = tpu.strided_load %arg15[%c2_157, %c0_158] {strides = array<i32: 2, 1>} : memref<13x32xf32, #tpu.memory_space<vmem>>, vector<5x32xf32>
    %144 = arith.maximumf %142, %143 : vector<5x32xf32>
    %c3_159 = arith.constant 3 : index
    %c0_160 = arith.constant 0 : index
    %145 = tpu.strided_load %arg15[%c3_159, %c0_160] {strides = array<i32: 2, 1>} : memref<13x32xf32, #tpu.memory_space<vmem>>, vector<5x32xf32>
    %146 = arith.maximumf %144, %145 : vector<5x32xf32>
    %c4_161 = arith.constant 4 : index
    %c0_162 = arith.constant 0 : index
    %147 = tpu.strided_load %arg15[%c4_161, %c0_162] {strides = array<i32: 2, 1>} : memref<13x32xf32, #tpu.memory_space<vmem>>, vector<5x32xf32>
    %148 = arith.maximumf %146, %147 : vector<5x32xf32>
    %cst_163 = arith.constant dense<0.000000e+00> : vector<32xf32>
    %149 = vector.multi_reduction <add>, %148, %cst_163 [0] : vector<5x32xf32> to vector<32xf32>
    %150 = vector.shape_cast %149 : vector<32xf32> to vector<1x32xf32>
    %cst_164 = arith.constant 2.000000e-01 : f32
    %151 = vector.broadcast %cst_164 : f32 to vector<1x32xf32>
    %152 = arith.mulf %150, %151 : vector<1x32xf32>
    %c0_165 = arith.constant 0 : index
    %c0_166 = arith.constant 0 : index
    %153 = vector.load %arg7[%c0_165, %c0_166] : memref<32x2xf32, #tpu.memory_space<vmem>>, vector<32x2xf32>
    %cst_167 = arith.constant dense<0.000000e+00> : vector<1x2xf32>
    %154 = tpu.matmul %152, %153, %cst_167 {dimension_numbers = #tpu.dot_dimension_numbers<[1], [0], [0], [1], [0, 0, 1, 1], [], []>} : vector<1x32xf32>, vector<32x2xf32>, vector<1x2xf32> -> vector<1x2xf32>
    %c5 = arith.constant 5 : index
    %c0_168 = arith.constant 0 : index
    %155 = vector.load %arg8[%c5, %c0_168] : memref<6x32xf32, #tpu.memory_space<vmem>>, vector<1x2xf32>
    %156 = arith.addf %154, %155 : vector<1x2xf32>
    %157 = vector.shape_cast %156 : vector<1x2xf32> to vector<1x1x2xf32>
    %c0_169 = arith.constant 0 : index
    %c0_170 = arith.constant 0 : index
    %c0_171 = arith.constant 0 : index
    %158 = vector.load %arg9[%c0_169, %c0_170, %c0_171] : memref<1x1x2xf32, #tpu.memory_space<vmem>>, vector<1x1x2xf32>
    tpu.vector_store %arg9[%c0_169, %c0_170, %c0_171], %157 {strides = array<i32>} : memref<1x1x2xf32, #tpu.memory_space<vmem>>, vector<1x1x2xf32>,
    return
  }
  func.func @transform_0(%arg0: i32) -> (i32, i32, i32) {
    %c0_i32 = arith.constant 0 : i32
    %c0_i32_0 = arith.constant 0 : i32
    %c0_i32_1 = arith.constant 0 : i32
    return %arg0, %c0_i32, %c0_i32_0 : i32, i32, i32
  }
  func.func @transform_1(%arg0: i32) -> (i32, i32, i32) {
    %c0_i32 = arith.constant 0 : i32
    %c0_i32_0 = arith.constant 0 : i32
    %c0_i32_1 = arith.constant 0 : i32
    %c0_i32_2 = arith.constant 0 : i32
    return %c0_i32, %c0_i32_0, %c0_i32_1 : i32, i32, i32
  }
  func.func @transform_2(%arg0: i32) -> (i32, i32, i32) {
    %c0_i32 = arith.constant 0 : i32
    %c0_i32_0 = arith.constant 0 : i32
    %c0_i32_1 = arith.constant 0 : i32
    %c0_i32_2 = arith.constant 0 : i32
    return %c0_i32, %c0_i32_0, %c0_i32_1 : i32, i32, i32
  }
  func.func @transform_3(%arg0: i32) -> (i32, i32, i32) {
    %c0_i32 = arith.constant 0 : i32
    %c0_i32_0 = arith.constant 0 : i32
    %c0_i32_1 = arith.constant 0 : i32
    %c0_i32_2 = arith.constant 0 : i32
    return %c0_i32, %c0_i32_0, %c0_i32_1 : i32, i32, i32
  }
  func.func @transform_4(%arg0: i32) -> (i32, i32) {
    %c0_i32 = arith.constant 0 : i32
    %c0_i32_0 = arith.constant 0 : i32
    %c0_i32_1 = arith.constant 0 : i32
    return %c0_i32, %c0_i32_0 : i32, i32
  }
  func.func @transform_5(%arg0: i32) -> (i32, i32) {
    %c0_i32 = arith.constant 0 : i32
    %c0_i32_0 = arith.constant 0 : i32
    %c0_i32_1 = arith.constant 0 : i32
    return %c0_i32, %c0_i32_0 : i32, i32
  }
  func.func @transform_6(%arg0: i32) -> (i32, i32) {
    %c0_i32 = arith.constant 0 : i32
    %c0_i32_0 = arith.constant 0 : i32
    %c0_i32_1 = arith.constant 0 : i32
    return %c0_i32, %c0_i32_0 : i32, i32
  }
  func.func @transform_7(%arg0: i32) -> (i32, i32) {
    %c0_i32 = arith.constant 0 : i32
    %c0_i32_0 = arith.constant 0 : i32
    %c0_i32_1 = arith.constant 0 : i32
    return %c0_i32, %c0_i32_0 : i32, i32
  }
  func.func @transform_8(%arg0: i32) -> (i32, i32, i32) {
    %c0_i32 = arith.constant 0 : i32
    %c0_i32_0 = arith.constant 0 : i32
    %c0_i32_1 = arith.constant 0 : i32
    return %arg0, %c0_i32, %c0_i32_0 : i32, i32, i32
  }
}

</mosaic_0001>

<bundles_post_ra>
// kernel: tpu_custom_call.1
= control target key start
LH: loop header
LB: loop body
LE: loop exit
PB: predicated region body
PF: predicated region fallthrough
CT: control target
= control target key end

     0   :  { %13 = vsyncpa [#allocation9], 0  ;;  %s2265_s0 = inlined_call_operand.vmem [shape: f32[2,64,4], index: 0, kind: input, shape index: {}]   ;;  %s2266_s1 = inlined_call_operand.vmem [shape: f32[5,4,8], index: 1, kind: input, shape index: {}]   ;;  %s2267_s2 = inlined_call_operand.vmem [shape: f32[5,8,16], index: 2, kind: input, shape index: {}]   ;;  %s2268_s3 = inlined_call_operand.vmem [shape: f32[5,16,32], index: 3, kind: input, shape index: {}]   ;;  %s2269_s4 = inlined_call_operand.hbm [shape: f32[8,16], index: 4, kind: input, shape index: {}]   ;;  %s2270_s5 = inlined_call_operand.vmem [shape: f32[16,32], index: 5, kind: input, shape index: {}]   ;;  %s2271_s6 = inlined_call_operand.vmem [shape: f32[32,2], index: 6, kind: input, shape index: {}]   ;;  %s2272_s7 = inlined_call_operand.hbm [shape: f32[6,32], index: 7, kind: input, shape index: {}]   ;;  %s2273_s8 = inlined_call_operand.hbm [shape: f32[2,1,2], index: 8, kind: output, shape index: {}]  }
   0x1   :  { %14 = vsyncpa [#allocation12], 0 }
   0x2   :  { %15 = vsyncpa [#allocation10], 0 }
   0x3   :  { %17 = vsyncpa [#allocation10 + $0x1], 0  ;;  %s1920_s27 = smov 0   ;;  %s1922_s28 = smov 0  }
   0x4   :  { %s1924_s29 = smov 0   ;;  %s1926_s30 = smov 0  }
   0x5 LB: > { %s1941_s9 = sadd.s32 4294967295, %s1870_s30   ;;  %s1561_s10 = sadd.s32 4294967294, %s1870_s30   ;;  %s1870_s30 = sphi %s1926_s30, %s2280_s30   ;;  %s1866_s29 = sphi %s1924_s29, %s2279_s29   ;;  %s1862_s28 = sphi %s1922_s28, %s2278_s28   ;;  %s1858_s27 = sphi %s1920_s27, %s2277_s27  }
   0x6   : > { %s1945_s11 = sadd.s32 1, %s1870_s30   ;;  %s203_s12 = sadd.s32 1, %s1866_s29 }
   0x7   : > { %s200_s13 = ssub.s32 %s1870_s30, %s1945_s11  ;;  %p213_p0 = scmp.ne.s32.totalorder %s1866_s29, %s1862_s28 }
   0x8   : > { %p201_p1 = scmp.eq.s32.totalorder %s200_s13, 0  ;;  %p214_p2 = scmp.eq.s32.totalorder %s1941_s9, 1 }
   0x9   : > { %p219_p3 = scmp.ne.s32.totalorder %s1862_s28, %s1858_s27  ;;  %p220_p4 = scmp.eq.s32.totalorder %s1561_s10, 1 }
   0xa   : > { %s1956_s14 = scalar_select %p201_p1, %s1866_s29, %s203_s12  }
   0xb   : > { %p1958_p5 = por %p214_p2, %p213_p0  ;;  %p1962_p6 = por %p220_p4, %p219_p3 }
   0xc   : > { %p1562_p7 = scmp.ge.s32.totalorder %s1870_s30, 1  ;;  %p227_p8 = scmp.lt.s32.totalorder %s1870_s30, 3 }
   0xd   : > { %p1695_p9 = scmp.eq.s32.totalorder %s1941_s9, 0  ;;  %s248_s20 = sshll.u32 %s2269_s4, 4  ;;  %s249_s20 = int_to_ptr.hbm [resolvable:$true] %s248_s20 }
   0xe   : > { %p1969_p10 = pnand %p1562_p7, %p227_p8  ;;  %s1872_s21 = smov [#allocation8]  }
   0xf   : > { %s250_s22 = sshll.u32 %s1872_s21, 4  ;;  %s266_s25 = sshll.u32 %s2272_s7, 4  ;;  %s251_s22 = int_to_ptr.vmem [resolvable:$true] %s250_s22  ;;  %s267_s25 = int_to_ptr.hbm [resolvable:$true] %s266_s25 }
  0x10   : > { %p1684_p11 = pneg %p1969_p10  ;;  %s1873_s26 = smov [#allocation11]  }
  0x11   : > { %s268_s10 = sshll.u32 %s1873_s26, 4  ;;  %289 = sbr.rel (%p1969_p10) target bundleno = 840 (0x348), region = 52  ;;  %s269_s10 = int_to_ptr.vmem [resolvable:$true] %s268_s10 }
  0x12   : > { %p1685_p12 = pnand %p1695_p9, %p1684_p11 }
  0x14   : > { %1687 = dma.hbm_to_vmem [thread:$0]  (!%p1685_p12), %s249_s20, 128, %s251_s22, [#allocation9]  }
  0x15   : > { %1690 = dma.hbm_to_vmem [thread:$0]  (!%p1685_p12), %s267_s25, 128, %s269_s10, [#allocation12]  }
  0x16   : > { %1845 = dma.done.wait (%p1695_p9), [#allocation9], 128  }
  0x17   : > { %1847 = vsyncadd (%p1695_p9), [#allocation9], 4294967168 }
  0x18   : > { %1849 = dma.done.wait (%p1695_p9), [#allocation12], 128  }
  0x19   : > { %1851 = vsyncadd (%p1695_p9), [#allocation12], 4294967168  ;;  %p328_p13 = scmp.lt.s32.totalorder %s1941_s9, 1  ;;  %vm333_vm0 = vcmask 25600   ;;  %v1874_v0 = vmov 0.0   ;;  %vm396_vm1 = vcmask 1043456   ;;  %s1480_s23 = scalar_lea.hbm %s2273_s8, %s1941_s9 }
  0x1a   : > { %334 = vst.msk [vmem:[#allocation2] sm:$0x3] %vm333_vm0, %v1874_v0  ;;  %vm344_vm2 = vcmask 31744   ;;  %v1571_v1 = vld [vmem:[%s2266_s1 + $0x4] sm:$0xf]  ;;  %v1620_v60 = vld [vmem:[%s2267_s2 + $0x8] sm:$0xff] }
  0x1b   : > { %s329_s12 = scalar_select %p328_p13, %s1941_s9, 1  ;;  %335 = vst.msk [vmem:[#allocation2 + $0x42] sm:$0x3] %vm333_vm0, %v1874_v0  ;;  %v361_v2 = vld [vmem:[%s2266_s1] sm:$0xf]  ;;  %1572 = vmatpush.msk.msra.mxu0 %vm396_vm1, %v1571_v1  ;;  %v1629_v61 = vld [vmem:[%s2267_s2 + $0x10] sm:$0xff] }
  0x1c   : > { %v1590_v3 = vld [vmem:[%s2266_s1 + $0x8] sm:$0xf]  ;;  %1581 = vmatpush.msk.msra.mxu1 %vm396_vm1, %v361_v2  ;;  %v1610_v5 = vld [vmem:[%s2266_s1 + $0x10] sm:$0xf]  ;;  %v1600_v6 = vld [vmem:[%s2266_s1 + $0xc] sm:$0xf] }
  0x1d   : > { %s1671_s13 = sshll.u32 %s329_s12, 6  ;;  %1591 = vmatpush.msk.msra.mxu2 %vm396_vm1, %v1590_v3  ;;  %1611 = vmatpush.msk.msrb.mxu0 %vm396_vm1, %v1610_v5  ;;  %v861_v59 = vld [vmem:[%s2267_s2] sm:$0xff]  ;;  %vm785_vm3 = vcmask 64512   ;;  %vm849_vm4 = vcmask 58368   ;;  %vm855_vm5 = vcmask 62464   ;;  %vm1161_vm6 = vcmask 130048  }
  0x1e   : > { %s2000_s19 = scalar_lea.vmem %s2265_s0, %s1671_s13  ;;  %1601 = vmatpush.msk.msra.mxu3 %vm396_vm1, %v1600_v6  ;;  %895 = vmatpush.msrb.mxu1 %v1620_v60  ;;  %850 = vst.msk [vmem:[#allocation4] sm:$0x3] %vm849_vm4, %v1874_v0  ;;  %vm1194_vm7 = vcmask 123904   ;;  %vm1165_vm8 = vcmask 128000   ;;  %vm1198_vm9 = vcmask 126976   ;;  %vm1416_vm10 = vcmask 261120  }
  0x1f   : > { %v336_v4 = vld [vmem:[%s2000_s19] sm:$0xff]  ;;  %v337_v7 = vld [vmem:[%s2000_s19 + $0x8] sm:$0xff]  ;;  %v338_v8 = vld [vmem:[%s2000_s19 + $0x10] sm:$0xff]  ;;  %936 = vmatpush.msrb.mxu2 %v861_v59  ;;  %851 = vst.msk [vmem:[#allocation4 + $0x20] sm:$0x3] %vm849_vm4, %v1874_v0  ;;  %vm1418_vm11 = vcmask 258048  }
  0x20   : > { %345 = vst.msk [vmem:[#allocation2 + $0x2] sm:$0xff] %vm344_vm2, %v336_v4  ;;  %v339_v9 = vld [vmem:[%s2000_s19 + $0x18] sm:$0xff]  ;;  %v340_v10 = vld [vmem:[%s2000_s19 + $0x20] sm:$0xff]  ;;  %v341_v11 = vld [vmem:[%s2000_s19 + $0x28] sm:$0xff]  ;;  %983 = vmatpush.msrb.mxu3 %v1629_v61  ;;  %s326_s20 = sand.u32 1, %s1862_s28   ;;  %s1484_s26 = sshll.u32 %s1480_s23, 4  ;;  %s1485_s26 = int_to_ptr.hbm [resolvable:$true] %s1484_s26 }
  0x21   : > { %346 = vst.msk [vmem:[#allocation2 + $0xa] sm:$0xff] %vm344_vm2, %v337_v7  ;;  %v342_v20 = vld [vmem:[%s2000_s19 + $0x30] sm:$0xff]  ;;  %v343_v21 = vld [vmem:[%s2000_s19 + $0x38] sm:$0xff]  ;;  %s327_s24 = scalar_lea.vmem [#allocation13], %s326_s20  ;;  %vm1469_vm12 = vcmask 8192   ;;  %s1472_s10 = scalar_lea.sflag [#allocation10], %s326_s20 }
  0x22   : > { %347 = vst.msk [vmem:[#allocation2 + $0x12] sm:$0xff] %vm344_vm2, %v338_v8  ;;  %s1482_s25 = sshll.u32 %s327_s24, 4  ;;  %s1814_s12 = sshra.s32 %s1485_s26, 4  ;;  %s1483_s25 = int_to_ptr.vmem [resolvable:$true] %s1482_s25  ;;  %s1815_s12 = int_to_ptr.hbm [resolvable:$true] %s1814_s12 }
  0x23   : > { %348 = vst.msk [vmem:[#allocation2 + $0x1a] sm:$0xff] %vm344_vm2, %v339_v9  ;;  %s1816_s13 = scalar_lea.hbm %s1815_s12, 1  ;;  %s1820_s18 = scalar_lea.hbm %s2273_s8, 2 }
  0x24   : > { %349 = vst.msk [vmem:[#allocation2 + $0x22] sm:$0xff] %vm344_vm2, %v340_v10  ;;  %p1817_p0 = scmp.ne.s32.totalorder %s1815_s12, %s1816_s13  ;;  %p1821_p3 = scmp.lt.s32.totalorder %s1815_s12, %s2273_s8 }
  0x25   : > { %350 = vst.msk [vmem:[#allocation2 + $0x2a] sm:$0xff] %vm344_vm2, %v341_v11  ;;  %p1822_p4 = scmp.lt.s32.totalorder %s1820_s18, %s1816_s13 }
  0x26   : > { %351 = vst.msk [vmem:[#allocation2 + $0x32] sm:$0xff] %vm344_vm2, %v342_v20  ;;  %p1818_p1 = pnand %p1817_p0, %p1958_p5 }
  0x27   : > { %v362_v12 = vld [vmem:[#allocation2 + $0x1] sm:$0xff]  ;;  %352 = vst.msk [vmem:[#allocation2 + $0x3a] sm:$0xff] %vm344_vm2, %v343_v21  ;;  %p1823_p7 = por %p1822_p4, %p1821_p3 }
  0x28   : > { %v353_v13 = vld [vmem:[#allocation2] sm:$0xff]  ;;  %1573 = vmatmul.msk.f32.vlgmr.msra.gmra.mxu0 %vm344_vm2, %v362_v12  ;;  %v363_v16 = vld [vmem:[#allocation2 + $0x9] sm:$0xff]  ;;  %1195 = vst.msk [vmem:[#allocation6] sm:$0x3] %vm1194_vm7, %v1874_v0  ;;  %p1819_p2 = pneg %p1818_p1 }
  0x29   : > { %v509_v14 = vld [vmem:[#allocation2 + $0x2] sm:$0xff]  ;;  %1582 = vmatmul.msk.f32.vlgmr.msra.gmra.mxu1 %vm344_vm2, %v353_v13  ;;  %v510_v18 = vld [vmem:[#allocation2 + $0xa] sm:$0xff]  ;;  %v511_v24 = vld [vmem:[#allocation2 + $0x12] sm:$0xff]  ;;  %1196 = vst.msk [vmem:[#allocation6 + $0xf] sm:$0x3] %vm1194_vm7, %v1874_v0 }
  0x2a   : > { %v595_v15 = vld [vmem:[#allocation2 + $0x3] sm:$0xff]  ;;  %1592 = vmatmul.msk.f32.vlgmr.msra.gmra.mxu2 %vm344_vm2, %v509_v14  ;;  %v596_v19 = vld [vmem:[#allocation2 + $0xb] sm:$0xff]  ;;  %v597_v25 = vld [vmem:[#allocation2 + $0x13] sm:$0xff]  ;;  %p1824_p8 = pnand %p1823_p7, %p1819_p2 }
  0x2b   : > { %1602 = vmatmul.msk.f32.vlgmr.msra.gmra.mxu3 %vm344_vm2, %v595_v15  ;;  %v354_v17 = vld [vmem:[#allocation2 + $0x8] sm:$0xff]  ;;  %v364_v22 = vld [vmem:[#allocation2 + $0x11] sm:$0xff]  ;;  %v365_v26 = vld [vmem:[#allocation2 + $0x19] sm:$0xff] }
  0x2c   : > { %v355_v23 = vld [vmem:[#allocation2 + $0x10] sm:$0xff]  ;;  %v356_v27 = vld [vmem:[#allocation2 + $0x18] sm:$0xff]  ;;  %v366_v30 = vld [vmem:[#allocation2 + $0x21] sm:$0xff] }
  0x2d   : > { %v512_v28 = vld [vmem:[#allocation2 + $0x1a] sm:$0xff]  ;;  %v513_v32 = vld [vmem:[#allocation2 + $0x22] sm:$0xff]  ;;  %v514_v36 = vld [vmem:[#allocation2 + $0x2a] sm:$0xff] }
  0x2e   : > { %v598_v29 = vld [vmem:[#allocation2 + $0x1b] sm:$0xff]  ;;  %v599_v33 = vld [vmem:[#allocation2 + $0x23] sm:$0xff]  ;;  %v600_v37 = vld [vmem:[#allocation2 + $0x2b] sm:$0xff] }
  0x2f   : > { %v357_v31 = vld [vmem:[#allocation2 + $0x20] sm:$0xff]  ;;  %v367_v34 = vld [vmem:[#allocation2 + $0x29] sm:$0xff]  ;;  %v368_v38 = vld [vmem:[#allocation2 + $0x31] sm:$0xff] }
  0x30   : > { %1574 = vmatmul.msk.f32.gmra.mxu0 %vm344_vm2, %v363_v16  ;;  %v358_v35 = vld [vmem:[#allocation2 + $0x28] sm:$0xff]  ;;  %v359_v39 = vld [vmem:[#allocation2 + $0x30] sm:$0xff]  ;;  %v369_v42 = vld [vmem:[#allocation2 + $0x39] sm:$0xff] }
  0x31   : > { %1583 = vmatmul.msk.f32.gmra.mxu1 %vm344_vm2, %v354_v17  ;;  %v515_v40 = vld [vmem:[#allocation2 + $0x32] sm:$0xff]  ;;  %v516_v44 = vld [vmem:[#allocation2 + $0x3a] sm:$0xff]  ;;  %v681_v46 = vld [vmem:[#allocation2 + $0x4] sm:$0xff] }
  0x32   : > { %1593 = vmatmul.msk.f32.gmra.mxu2 %vm344_vm2, %v510_v18  ;;  %v601_v41 = vld [vmem:[#allocation2 + $0x33] sm:$0xff]  ;;  %v602_v45 = vld [vmem:[#allocation2 + $0x3b] sm:$0xff]  ;;  %v685_v50 = vld [vmem:[#allocation2 + $0x24] sm:$0xff] }
  0x33   : > { %1603 = vmatmul.msk.f32.gmra.mxu3 %vm344_vm2, %v596_v19  ;;  %v360_v43 = vld [vmem:[#allocation2 + $0x38] sm:$0xff]  ;;  %v682_v47 = vld [vmem:[#allocation2 + $0xc] sm:$0xff]  ;;  %v2093_v13 = vld [vmem:[#allocation11] ss:$0 sm:$0xff] }
  0x34   : > { %v683_v48 = vld [vmem:[#allocation2 + $0x14] sm:$0xff]  ;;  %v684_v49 = vld [vmem:[#allocation2 + $0x1c] sm:$0xff]  ;;  %v686_v51 = vld [vmem:[#allocation2 + $0x2c] sm:$0xff] }
  0x35   : > { %v687_v52 = vld [vmem:[#allocation2 + $0x34] sm:$0xff]  ;;  %v688_v53 = vld [vmem:[#allocation2 + $0x3c] sm:$0xff] }
  0x36   : > { %v1648_v0 = vld [vmem:[%s2268_s3 + $0x10] sm:$0xff] }
  0x38   : > { %1575 = vmatmul.msk.f32.gmra.mxu0 %vm344_vm2, %v364_v22 }
  0x39   : > { %1584 = vmatmul.msk.f32.gmra.mxu1 %vm344_vm2, %v355_v23 }
  0x3a   : > { %1594 = vmatmul.msk.f32.gmra.mxu2 %vm344_vm2, %v511_v24 }
  0x3b   : > { %1604 = vmatmul.msk.f32.gmra.mxu3 %vm344_vm2, %v597_v25 }
  0x40   : > { %1576 = vmatmul.msk.f32.gmra.mxu0 %vm344_vm2, %v365_v26 }
  0x41   : > { %1585 = vmatmul.msk.f32.gmra.mxu1 %vm344_vm2, %v356_v27 }
  0x42   : > { %1595 = vmatmul.msk.f32.gmra.mxu2 %vm344_vm2, %v512_v28 }
  0x43   : > { %1605 = vmatmul.msk.f32.gmra.mxu3 %vm344_vm2, %v598_v29 }
  0x48   : > { %1577 = vmatmul.msk.f32.gmra.mxu0 %vm344_vm2, %v366_v30 }
  0x49   : > { %1586 = vmatmul.msk.f32.gmra.mxu1 %vm344_vm2, %v357_v31 }
  0x4a   : > { %1596 = vmatmul.msk.f32.gmra.mxu2 %vm344_vm2, %v513_v32 }
  0x4b   : > { %1606 = vmatmul.msk.f32.gmra.mxu3 %vm344_vm2, %v599_v33 }
  0x50   : > { %1578 = vmatmul.msk.f32.gmra.mxu0 %vm344_vm2, %v367_v34 }
  0x51   : > { %1587 = vmatmul.msk.f32.gmra.mxu1 %vm344_vm2, %v358_v35 }
  0x52   : > { %1597 = vmatmul.msk.f32.gmra.mxu2 %vm344_vm2, %v514_v36 }
  0x53   : > { %1607 = vmatmul.msk.f32.gmra.mxu3 %vm344_vm2, %v600_v37 }
  0x58   : > { %1579 = vmatmul.msk.f32.gmra.mxu0 %vm344_vm2, %v368_v38 }
  0x59   : > { %1588 = vmatmul.msk.f32.gmra.mxu1 %vm344_vm2, %v359_v39 }
  0x5a   : > { %1598 = vmatmul.msk.f32.gmra.mxu2 %vm344_vm2, %v515_v40 }
  0x5b   : > { %1608 = vmatmul.msk.f32.gmra.mxu3 %vm344_vm2, %v601_v41 }
  0x60   : > { %1580 = vmatmul.msk.f32.gmra.mxu0 %vm344_vm2, %v369_v42 }
  0x61   : > { %1589 = vmatmul.msk.f32.gmra.mxu1 %vm344_vm2, %v360_v43 }
  0x62   : > { %1599 = vmatmul.msk.f32.gmra.mxu2 %vm344_vm2, %v516_v44 }
  0x63   : > { %1609 = vmatmul.msk.f32.gmra.mxu3 %vm344_vm2, %v602_v45 }
  0x68   : > { %1612 = vmatmul.msk.f32.vlgmr.msrb.gmra.mxu0 %vm344_vm2, %v681_v46 }
  0x70   : > { %1613 = vmatmul.msk.f32.gmra.mxu0 %vm344_vm2, %v682_v47 }
  0x78   : > { %1614 = vmatmul.msk.f32.gmra.mxu0 %vm344_vm2, %v683_v48 }
  0x80   : > { %1615 = vmatmul.msk.f32.gmra.mxu0 %vm344_vm2, %v684_v49 }
  0x88   : > { %1616 = vmatmul.msk.f32.gmra.mxu0 %vm344_vm2, %v685_v50 }
  0x90   : > { %1617 = vmatmul.msk.f32.gmra.mxu0 %vm344_vm2, %v686_v51 }
  0x98   : > { %1618 = vmatmul.msk.f32.gmra.mxu0 %vm344_vm2, %v687_v52 }
  0xa0   : > { %1619 = vmatmul.msk.f32.gmra.mxu0 %vm344_vm2, %v688_v53 }
  0xa5   : > { %v417_v54 = vpop.f32.mrf.mxu0 }
  0xa6   : > { %v485_v62 = vpop.f32.mrf.mxu1 }
  0xa7   : > { %v486_v8 = vadd.f32 %v485_v62, %v417_v54 }
  0xad   : > { %v420_v55 = vpop.f32.mrf.mxu0  ;;  %v563_v1 = vpop.f32.mrf.mxu2 }
  0xae   : > { %v649_v2 = vpop.f32.mrf.mxu3  ;;  %v488_v4 = vpop.f32.mrf.mxu1  ;;  %v587_v9 = vadd.f32 %v563_v1, %v486_v8 }
  0xaf   : > { %v489_v15 = vadd.f32 %v488_v4, %v420_v55 }
  0xb0   : > { %v673_v12 = vadd.f32 %v649_v2, %v587_v9 }
  0xb5   : > { %v423_v56 = vpop.f32.mrf.mxu0  ;;  %v566_v5 = vpop.f32.mrf.mxu2 }
  0xb6   : > { %v652_v6 = vpop.f32.mrf.mxu3  ;;  %v491_v10 = vpop.f32.mrf.mxu1  ;;  %v588_v18 = vadd.f32 %v566_v5, %v489_v15  ;;  %v1113_v15 = vld [vmem:[#allocation8] sm:$0xff] }
  0xb7   : > { %v492_v25 = vadd.f32 %v491_v10, %v423_v56  ;;  %1143 = vmatpush.msra.mxu3 %v1113_v15 }
  0xb8   : > { %v674_v22 = vadd.f32 %v652_v6, %v588_v18 }
  0xbd   : > { %v426_v57 = vpop.f32.mrf.mxu0  ;;  %v569_v11 = vpop.f32.mrf.mxu2 }
  0xbe   : > { %v655_v17 = vpop.f32.mrf.mxu3  ;;  %v494_v21 = vpop.f32.mrf.mxu1  ;;  %v589_v27 = vadd.f32 %v569_v11, %v492_v25 }
  0xbf   : > { %v495_v34 = vadd.f32 %v494_v21, %v426_v57 }
  0xc0   : > { %v675_v31 = vadd.f32 %v655_v17, %v589_v27 }
  0xc5   : > { %v429_v58 = vpop.f32.mrf.mxu0  ;;  %v572_v23 = vpop.f32.mrf.mxu2 }
  0xc6   : > { %v658_v29 = vpop.f32.mrf.mxu3  ;;  %v497_v32 = vpop.f32.mrf.mxu1  ;;  %v590_v37 = vadd.f32 %v572_v23, %v495_v34 }
  0xc7   : > { %v498_v43 = vadd.f32 %v497_v32, %v429_v58 }
  0xc8   : > { %v676_v41 = vadd.f32 %v658_v29, %v590_v37 }
  0xcd   : > { %v2087_v63 = vpop.f32.mrf.mxu0  ;;  %v575_v36 = vpop.f32.mrf.mxu2 }
  0xce   : > { %v661_v40 = vpop.f32.mrf.mxu3  ;;  %v500_v45 = vpop.f32.mrf.mxu1  ;;  %v591_v48 = vadd.f32 %v575_v36, %v498_v43 }
  0xcf   : > { %v501_v58 = vadd.f32 %v500_v45, %v2087_v63 }
  0xd0   : > { %v677_v54 = vadd.f32 %v661_v40, %v591_v48 }
  0xd5   : > { %v2089_v3 = vpop.f32.mrf.mxu0  ;;  %v578_v50 = vpop.f32.mrf.mxu2 }
  0xd6   : > { %v664_v56 = vpop.f32.mrf.mxu3  ;;  %v592_v1 = vadd.f32 %v578_v50, %v501_v58  ;;  %v503_v5 = vpop.f32.mrf.mxu1 }
  0xd7   : > { %v504_v63 = vadd.f32 %v503_v5, %v2089_v3 }
  0xd8   : > { %v678_v9 = vadd.f32 %v664_v56, %v592_v1 }
  0xdd   : > { %v2091_v7 = vpop.f32.mrf.mxu0  ;;  %v581_v8 = vpop.f32.mrf.mxu2 }
  0xde   : > { %v506_v25 = vpop.f32.mrf.mxu1 }
  0xdf   : > { %v507_v32 = vadd.f32 %v506_v25, %v2091_v7 }
  0xe5   : > { %v735_v14 = vpop.f32.mrf.mxu0  ;;  %v584_v29 = vpop.f32.mrf.mxu2 }
  0xe6   : > { %v759_v16 = vadd.f32 %v735_v14, %v673_v12  ;;  %v1639_v12 = vld [vmem:[%s2267_s2 + $0x20] sm:$0xff]  ;;  %v1634_v14 = vld [vmem:[%s2267_s2 + $0x18] sm:$0xff]  ;;  %v594_v36 = vadd.f32 %v584_v29, %v507_v32 }
  0xe7   : > { %1085 = vmatpush.msra.mxu2 %v1639_v12  ;;  %1034 = vmatpush.msra.mxu1 %v1634_v14 }
  0xe8   : > { %v769_v19 = vadd.f32 %v2093_v13, %v759_v16  ;;  %v667_v16 = vpop.f32.mrf.mxu3 }
  0xea   : > { %v777_v20 = vmax.f32 %v769_v19, 0.0  ;;  %v593_v19 = vadd.f32 %v581_v8, %v504_v63 }
  0xec   : > { %786 = vst.msk [vmem:[#allocation3] sm:$0xff] %vm785_vm3, %v777_v20  ;;  %v679_v27 = vadd.f32 %v667_v16, %v593_v19 }
  0xed   : > { %v738_v24 = vpop.f32.mrf.mxu0 }
  0xee   : > { %v760_v26 = vadd.f32 %v738_v24, %v674_v22 }
  0xf0   : > { %v770_v28 = vadd.f32 %v2093_v13, %v760_v26 }
  0xf2   : > { %v778_v30 = vmax.f32 %v770_v28, 0.0 }
  0xf4   : > { %787 = vst.msk [vmem:[#allocation3 + $0x8] sm:$0xff] %vm785_vm3, %v778_v30 }
  0xf5   : > { %v741_v33 = vpop.f32.mrf.mxu0 }
  0xf6   : > { %v761_v35 = vadd.f32 %v741_v33, %v675_v31 }
  0xf8   : > { %v771_v38 = vadd.f32 %v2093_v13, %v761_v35 }
  0xfa   : > { %v779_v39 = vmax.f32 %v771_v38, 0.0 }
  0xfb   : > { %v794_v46 = vld [vmem:[#allocation3] ss:$2 sm:$0xff]  ;;  %v802_v47 = vld [vmem:[#allocation3 + $0x1] ss:$2 sm:$0xff] }
  0xfc   : > { %788 = vst.msk [vmem:[#allocation3 + $0x10] sm:$0xff] %vm785_vm3, %v779_v39  ;;  %v809_v51 = vmax.f32 %v794_v46, %v802_v47  ;;  %v670_v39 = vpop.f32.mrf.mxu3 }
  0xfd   : > { %v744_v42 = vpop.f32.mrf.mxu0 }
  0xfe   : > { %v762_v44 = vadd.f32 %v744_v42, %v676_v41  ;;  %v680_v41 = vadd.f32 %v670_v39, %v594_v36  ;;  %v2158_v39 = vld [vmem:[#allocation11 + $0x2] ss:$0 sm:$0xff] }
 0x100   : > { %v772_v49 = vadd.f32 %v2093_v13, %v762_v44 }
 0x102   : > { %v780_v52 = vmax.f32 %v772_v49, 0.0 }
 0x103   : > { %v814_v53 = vld [vmem:[#allocation3 + $0x2] ss:$2 sm:$0xff]  ;;  %v826_v57 = vld [vmem:[#allocation3 + $0x3] ss:$2 sm:$0xff] }
 0x104   : > { %v821_v55 = vmax.f32 %v809_v51, %v814_v53  ;;  %789 = vst.msk [vmem:[#allocation3 + $0x18] sm:$0xff] %vm785_vm3, %v780_v52  ;;  %v838_v62 = vld [vmem:[#allocation3 + $0x4] ss:$2 sm:$0xff] }
 0x105   : > { %v747_v59 = vpop.f32.mrf.mxu0 }
 0x106   : > { %v833_v60 = vmax.f32 %v821_v55, %v826_v57  ;;  %v763_v61 = vadd.f32 %v747_v59, %v677_v54 }
 0x108   : > { %v773_v2 = vadd.f32 %v2093_v13, %v763_v61  ;;  %v2107_v4 = vmax.f32 %v833_v60, %v838_v62 }
 0x10a   : > { %v781_v6 = vmax.f32 %v773_v2, 0.0  ;;  %852 = vst.msk [vmem:[#allocation4 + $0x2] sm:$0xff] %vm785_vm3, %v2107_v4 }
 0x10b   : > { %v796_v17 = vld [vmem:[#allocation3 + $0x10] ss:$2 sm:$0xff]  ;;  %v804_v18 = vld [vmem:[#allocation3 + $0x11] ss:$2 sm:$0xff] }
 0x10c   : > { %790 = vst.msk [vmem:[#allocation3 + $0x20] sm:$0xff] %vm785_vm3, %v781_v6  ;;  %v810_v23 = vmax.f32 %v796_v17, %v804_v18 }
 0x10d   : > { %v750_v10 = vpop.f32.mrf.mxu0 }
 0x10e   : > { %v764_v11 = vadd.f32 %v750_v10, %v678_v9 }
 0x110   : > { %v774_v20 = vadd.f32 %v2093_v13, %v764_v11 }
 0x111   : > { %v862_v3 = vld [vmem:[#allocation4 + $0x1] sm:$0xff] }
 0x112   : > { %v857_v21 = vld [vmem:[#allocation4] sm:$0xff]  ;;  %v782_v24 = vmax.f32 %v774_v20, 0.0  ;;  %1621 = vmatmul.msk.f32.vlgmr.msrb.gmra.mxu1 %vm785_vm3, %v862_v3 }
 0x113   : > { %v950_v22 = vld [vmem:[#allocation4 + $0x2] sm:$0xff]  ;;  %1625 = vmatmul.msk.f32.vlgmr.msrb.gmra.mxu2 %vm785_vm3, %v857_v21  ;;  %v816_v26 = vld [vmem:[#allocation3 + $0x12] ss:$2 sm:$0xff]  ;;  %v828_v30 = vld [vmem:[#allocation3 + $0x13] ss:$2 sm:$0xff] }
 0x114   : > { %1630 = vmatmul.msk.f32.vlgmr.msrb.gmra.mxu3 %vm785_vm3, %v950_v22  ;;  %v822_v28 = vmax.f32 %v810_v23, %v816_v26  ;;  %791 = vst.msk [vmem:[#allocation3 + $0x28] sm:$0xff] %vm785_vm3, %v782_v24  ;;  %v840_v35 = vld [vmem:[#allocation3 + $0x14] ss:$2 sm:$0xff] }
 0x115   : > { %v753_v31 = vpop.f32.mrf.mxu0  ;;  %v1649_v24 = vld [vmem:[%s2268_s3 + $0x18] sm:$0xff] }
 0x116   : > { %v765_v33 = vadd.f32 %v753_v31, %v679_v27  ;;  %v834_v34 = vmax.f32 %v822_v28, %v828_v30  ;;  %1229 = vmatpush.msra.mxu0 %v1649_v24  ;;  %1672 = vmatpush.msrb.mxu3 %v1649_v24 }
 0x118   : > { %v775_v37 = vadd.f32 %v2093_v13, %v765_v33  ;;  %v846_v38 = vmax.f32 %v834_v34, %v840_v35  ;;  %v2156_v35 = vld [vmem:[#allocation11 + $0x1] ss:$0 sm:$0xff]  ;;  %1230 = vmatpush.msra.mxu0 %v1648_v0  ;;  %1673 = vmatpush.msrb.mxu3 %v1648_v0 }
 0x11a   : > { %v783_v40 = vmax.f32 %v775_v37, 0.0  ;;  %853 = vst.msk [vmem:[#allocation4 + $0xa] sm:$0xff] %vm785_vm3, %v846_v38 }
 0x11b   : > { %v798_v44 = vld [vmem:[#allocation3 + $0x20] ss:$2 sm:$0xff]  ;;  %v806_v45 = vld [vmem:[#allocation3 + $0x21] ss:$2 sm:$0xff] }
 0x11c   : > { %792 = vst.msk [vmem:[#allocation3 + $0x30] sm:$0xff] %vm785_vm3, %v783_v40  ;;  %v811_v49 = vmax.f32 %v798_v44, %v806_v45 }
 0x11d   : > { %v756_v42 = vpop.f32.mrf.mxu0 }
 0x11e   : > { %v766_v43 = vadd.f32 %v756_v42, %v680_v41 }
 0x120   : > { %v776_v7 = vadd.f32 %v2093_v13, %v766_v43 }
 0x121   : > { %v863_v46 = vld [vmem:[#allocation4 + $0x9] sm:$0xff] }
 0x122   : > { %v858_v47 = vld [vmem:[#allocation4 + $0x8] sm:$0xff]  ;;  %v784_v50 = vmax.f32 %v776_v7, 0.0  ;;  %1622 = vmatmul.msk.f32.gmra.mxu1 %vm785_vm3, %v863_v46 }
 0x123   : > { %v951_v48 = vld [vmem:[#allocation4 + $0xa] sm:$0xff]  ;;  %1626 = vmatmul.msk.f32.gmra.mxu2 %vm785_vm3, %v858_v47 }
 0x124   : > { %v818_v51 = vld [vmem:[#allocation3 + $0x22] ss:$2 sm:$0xff]  ;;  %1631 = vmatmul.msk.f32.gmra.mxu3 %vm785_vm3, %v951_v48  ;;  %793 = vst.msk [vmem:[#allocation3 + $0x38] sm:$0xff] %vm785_vm3, %v784_v50  ;;  %v830_v53 = vld [vmem:[#allocation3 + $0x23] ss:$2 sm:$0xff] }
 0x125   : > { %v823_v52 = vmax.f32 %v811_v49, %v818_v51  ;;  %v842_v55 = vld [vmem:[#allocation3 + $0x24] ss:$2 sm:$0xff] }
 0x126   : > { %v1001_v11 = vld [vmem:[#allocation4 + $0x3] sm:$0xff] }
 0x127   : > { %v835_v54 = vmax.f32 %v823_v52, %v830_v53  ;;  %v1052_v12 = vld [vmem:[#allocation4 + $0x4] sm:$0xff] }
 0x129   : > { %v847_v56 = vmax.f32 %v835_v54, %v842_v55 }
 0x12b   : > { %854 = vst.msk [vmem:[#allocation4 + $0x12] sm:$0xff] %vm785_vm3, %v847_v56  ;;  %v800_v13 = vld [vmem:[#allocation3 + $0x30] ss:$2 sm:$0x3f] }
 0x12c   : > { %v808_v57 = vld [vmem:[#allocation3 + $0x31] ss:$2 sm:$0x3f]  ;;  %v820_v58 = vld [vmem:[#allocation3 + $0x32] ss:$2 sm:$0x3f] }
 0x12d   : > { %v812_v59 = vmax.f32 %v800_v13, %v808_v57  ;;  %v832_v61 = vld [vmem:[#allocation3 + $0x33] ss:$2 sm:$0x3f]  ;;  %v844_v1 = vld [vmem:[#allocation3 + $0x34] ss:$2 sm:$0x3f] }
 0x12e   : > { %v1655_v13 = vld [vmem:[%s2268_s3 + $0x28] sm:$0xff] }
 0x12f   : > { %v824_v60 = vmax.f32 %v812_v59, %v820_v58  ;;  %1292 = vmatpush.msrb.mxu2 %v1655_v13  ;;  %v1202_v58 = vld [vmem:[%s2268_s3] sm:$0xff] }
 0x131   : > { %v836_v62 = vmax.f32 %v824_v60, %v832_v61  ;;  %v1654_v60 = vld [vmem:[%s2268_s3 + $0x20] sm:$0xff] }
 0x132   : > { %v864_v2 = vld [vmem:[#allocation4 + $0x11] sm:$0xff]  ;;  %1293 = vmatpush.msrb.mxu2 %v1654_v60 }
 0x133   : > { %v859_v5 = vld [vmem:[#allocation4 + $0x10] sm:$0xff]  ;;  %1623 = vmatmul.msk.f32.gmra.mxu1 %vm785_vm3, %v864_v2  ;;  %v848_v8 = vmax.f32 %v836_v62, %v844_v1  ;;  %v1663_v62 = vld [vmem:[%s2268_s3 + $0x48] sm:$0xff] }
 0x134   : > { %v952_v6 = vld [vmem:[#allocation4 + $0x12] sm:$0xff]  ;;  %1627 = vmatmul.msk.f32.gmra.mxu2 %vm785_vm3, %v859_v5  ;;  %1364 = vmatpush.msrb.mxu0 %v1663_v62 }
 0x135   : > { %1632 = vmatmul.msk.f32.gmra.mxu3 %vm785_vm3, %v952_v6  ;;  %856 = vst.msk [vmem:[#allocation4 + $0x1a] sm:$0x3f] %vm855_vm5, %v848_v8  ;;  %v1002_v14 = vld [vmem:[#allocation4 + $0xb] sm:$0xff]  ;;  %v1662_v6 = vld [vmem:[%s2268_s3 + $0x40] sm:$0xff] }
 0x136   : > { %v1053_v15 = vld [vmem:[#allocation4 + $0xc] sm:$0xff]  ;;  %1365 = vmatpush.msrb.mxu0 %v1662_v6  ;;  %v1738_v6 = vld [vmem:[#allocation11 + $0x4] ss:$0 sm:$0xff] }
 0x13c   : > { %v865_v9 = vld [vmem:[#allocation4 + $0x19] sm:$0x3f] }
 0x13d   : > { %v860_v10 = vld [vmem:[#allocation4 + $0x18] sm:$0x3f]  ;;  %1624 = vmatmul.msk.f32.gmra.mxu1 %vm785_vm3, %v865_v9 }
 0x13e   : > { %v953_v63 = vld [vmem:[#allocation4 + $0x1a] sm:$0x3f]  ;;  %1628 = vmatmul.msk.f32.gmra.mxu2 %vm785_vm3, %v860_v10 }
 0x13f   : > { %1633 = vmatmul.msk.f32.gmra.mxu3 %vm785_vm3, %v953_v63  ;;  %v1003_v16 = vld [vmem:[#allocation4 + $0x13] sm:$0xff]  ;;  %v1004_v18 = vld [vmem:[#allocation4 + $0x1b] sm:$0x3f] }
 0x140   : > { %v1054_v17 = vld [vmem:[#allocation4 + $0x14] sm:$0xff]  ;;  %v1055_v19 = vld [vmem:[#allocation4 + $0x1c] sm:$0x3f] }
 0x145   : > { %1635 = vmatmul.msk.f32.vlgmr.msra.gmra.mxu1 %vm785_vm3, %v1001_v11 }
 0x146   : > { %1640 = vmatmul.msk.f32.vlgmr.msra.gmra.mxu2 %vm785_vm3, %v1052_v12 }
 0x147   : > { %1644 = vmatmul.msk.f32.vlgmr.msra.gmra.mxu3 %vm785_vm3, %v2107_v4 }
 0x14d   : > { %1636 = vmatmul.msk.f32.gmra.mxu1 %vm785_vm3, %v1002_v14 }
 0x14e   : > { %1641 = vmatmul.msk.f32.gmra.mxu2 %vm785_vm3, %v1053_v15 }
 0x14f   : > { %1645 = vmatmul.msk.f32.gmra.mxu3 %vm785_vm3, %v846_v38 }
 0x155   : > { %1637 = vmatmul.msk.f32.gmra.mxu1 %vm785_vm3, %v1003_v16 }
 0x156   : > { %1642 = vmatmul.msk.f32.gmra.mxu2 %vm785_vm3, %v1054_v17 }
 0x157   : > { %1646 = vmatmul.msk.f32.gmra.mxu3 %vm785_vm3, %v847_v56  ;;  %v1203_v56 = vld [vmem:[%s2268_s3 + $0x8] sm:$0xff] }
 0x158   : > { %1258 = vmatpush.msrb.mxu1 %v1203_v56  ;;  %v1441_v56 = vld [vmem:[%s2271_s6] sm:$0xff] }
 0x15a   : > { %1259 = vmatpush.msrb.mxu1 %v1202_v58 }
 0x15d   : > { %1638 = vmatmul.msk.f32.gmra.mxu1 %vm785_vm3, %v1004_v18  ;;  %v1659_v18 = vld [vmem:[%s2268_s3 + $0x38] sm:$0xff] }
 0x15e   : > { %1643 = vmatmul.msk.f32.gmra.mxu2 %vm785_vm3, %v1055_v19  ;;  %v1658_v19 = vld [vmem:[%s2268_s3 + $0x30] sm:$0xff]  ;;  %1328 = vmatpush.msra.mxu3 %v1659_v18 }
 0x15f   : > { %1647 = vmatmul.msk.f32.gmra.mxu3 %vm785_vm3, %v848_v8 }
 0x160   : > { %1329 = vmatpush.msra.mxu3 %v1658_v19 }
 0x18f   : > { %v897_v4 = vpop.f32.mrf.mxu1 }
 0x196   : > { %v938_v20 = vpop.f32.mrf.mxu2 }
 0x197   : > { %v985_v3 = vpop.f32.mrf.mxu3  ;;  %v939_v30 = vadd.f32 %v938_v20, %v897_v4  ;;  %v1382_v4 = vld [vmem:[%s2270_s5 + $0x8] sm:$0xff] }
 0x198   : > { %1405 = vmatpush.msra.mxu1 %v1382_v4 }
 0x199   : > { %v997_v33 = vadd.f32 %v985_v3, %v939_v30  ;;  %v1381_v3 = vld [vmem:[%s2270_s5] sm:$0xff] }
 0x19a   : > { %1406 = vmatpush.msra.mxu1 %v1381_v3 }
 0x19f   : > { %v900_v21 = vpop.f32.mrf.mxu1 }
 0x1a6   : > { %v941_v22 = vpop.f32.mrf.mxu2 }
 0x1a7   : > { %v988_v23 = vpop.f32.mrf.mxu3  ;;  %v942_v37 = vadd.f32 %v941_v22, %v900_v21 }
 0x1a9   : > { %v998_v43 = vadd.f32 %v988_v23, %v942_v37 }
 0x1b0   : > { %v903_v25 = vpop.f32.mrf.mxu1 }
 0x1b7   : > { %v944_v26 = vpop.f32.mrf.mxu2 }
 0x1b8   : > { %v991_v27 = vpop.f32.mrf.mxu3  ;;  %v945_v48 = vadd.f32 %v944_v26, %v903_v25 }
 0x1ba   : > { %v906_v28 = vpop.f32.mrf.mxu1  ;;  %v999_v53 = vadd.f32 %v991_v27, %v945_v48 }
 0x1c1   : > { %v947_v29 = vpop.f32.mrf.mxu2 }
 0x1c2   : > { %v994_v31 = vpop.f32.mrf.mxu3  ;;  %v1036_v32 = vpop.f32.mrf.mxu1  ;;  %v948_v1 = vadd.f32 %v947_v29, %v906_v28 }
 0x1c3   : > { %v1048_v34 = vadd.f32 %v1036_v32, %v997_v33 }
 0x1c4   : > { %v1000_v10 = vadd.f32 %v994_v31, %v948_v1  ;;  %v1739_v1 = vld [vmem:[#allocation11 + $0x3] ss:$0 sm:$0xff] }
 0x1c9   : > { %v1087_v36 = vpop.f32.mrf.mxu2 }
 0x1ca   : > { %v1099_v38 = vadd.f32 %v1087_v36, %v1048_v34  ;;  %v1145_v40 = vpop.f32.mrf.mxu3  ;;  %v1039_v41 = vpop.f32.mrf.mxu1 }
 0x1cb   : > { %v1146_v45 = vadd.f32 %v2158_v39, %v1145_v40  ;;  %v1049_v46 = vadd.f32 %v1039_v41, %v998_v43 }
 0x1cc   : > { %v1105_v42 = vadd.f32 %v2156_v35, %v1099_v38 }
 0x1ce   : > { %v1109_v44 = vmax.f32 %v1105_v42, 0.0 }
 0x1d0   : > { %v1157_v7 = vadd.f32 %v1146_v45, %v1109_v44 }
 0x1d1   : > { %v1090_v47 = vpop.f32.mrf.mxu2 }
 0x1d2   : > { %1162 = vst.msk [vmem:[#allocation5] sm:$0xff] %vm1161_vm6, %v1157_v7  ;;  %v1100_v49 = vadd.f32 %v1090_v47, %v1049_v46  ;;  %v1148_v50 = vpop.f32.mrf.mxu3  ;;  %v1042_v51 = vpop.f32.mrf.mxu1 }
 0x1d3   : > { %v1149_v55 = vadd.f32 %v2158_v39, %v1148_v50  ;;  %v1050_v59 = vadd.f32 %v1042_v51, %v999_v53  ;;  %v1443_v53 = vld [vmem:[%s2271_s6 + $0x10] sm:$0xff] }
 0x1d4   : > { %v1106_v52 = vadd.f32 %v2156_v35, %v1100_v49 }
 0x1d6   : > { %v1110_v54 = vmax.f32 %v1106_v52, 0.0  ;;  %v1444_v52 = vld [vmem:[%s2271_s6 + $0x18] sm:$0xff] }
 0x1d7   : > { %1461 = vmatpush.msra.mxu2 %v1444_v52 }
 0x1d8   : > { %v1158_v57 = vadd.f32 %v1149_v55, %v1110_v54  ;;  %v1442_v54 = vld [vmem:[%s2271_s6 + $0x8] sm:$0xff] }
 0x1d9   : > { %v1093_v61 = vpop.f32.mrf.mxu2  ;;  %1462 = vmatpush.msra.mxu2 %v1443_v53 }
 0x1da   : > { %1163 = vst.msk [vmem:[#allocation5 + $0x8] sm:$0xff] %vm1161_vm6, %v1158_v57  ;;  %v1101_v2 = vadd.f32 %v1093_v61, %v1050_v59  ;;  %v1151_v5 = vpop.f32.mrf.mxu3  ;;  %v1045_v9 = vpop.f32.mrf.mxu1 }
 0x1db   : > { %v1152_v11 = vadd.f32 %v2158_v39, %v1151_v5  ;;  %v1051_v14 = vadd.f32 %v1045_v9, %v1000_v10  ;;  %1463 = vmatpush.msra.mxu2 %v1442_v54 }
 0x1dc   : > { %v1107_v8 = vadd.f32 %v2156_v35, %v1101_v2 }
 0x1dd   : > { %1464 = vmatpush.msra.mxu2 %v1441_v56 }
 0x1de   : > { %v1111_v63 = vmax.f32 %v1107_v8, 0.0 }
 0x1e0   : > { %v1159_v12 = vadd.f32 %v1152_v11, %v1111_v63 }
 0x1e1   : > { %v1096_v15 = vpop.f32.mrf.mxu2  ;;  %v1167_v21 = vld [vmem:[#allocation5] ss:$2 sm:$0xff]  ;;  %v1171_v22 = vld [vmem:[#allocation5 + $0x1] ss:$2 sm:$0xff] }
 0x1e2   : > { %1164 = vst.msk [vmem:[#allocation5 + $0x10] sm:$0xff] %vm1161_vm6, %v1159_v12  ;;  %v1102_v16 = vadd.f32 %v1096_v15, %v1051_v14  ;;  %v1154_v17 = vpop.f32.mrf.mxu3  ;;  %v1174_v25 = vmax.f32 %v1167_v21, %v1171_v22 }
 0x1e3   : > { %v1155_v24 = vadd.f32 %v2158_v39, %v1154_v17 }
 0x1e4   : > { %v1108_v20 = vadd.f32 %v2156_v35, %v1102_v16 }
 0x1e6   : > { %v1112_v23 = vmax.f32 %v1108_v20, 0.0 }
 0x1e8   : > { %v1160_v26 = vadd.f32 %v1155_v24, %v1112_v23 }
 0x1e9   : > { %v1177_v27 = vld [vmem:[#allocation5 + $0x2] ss:$2 sm:$0xff]  ;;  %v1183_v29 = vld [vmem:[#allocation5 + $0x3] ss:$2 sm:$0xff] }
 0x1ea   : > { %v1180_v28 = vmax.f32 %v1174_v25, %v1177_v27  ;;  %1166 = vst.msk [vmem:[#allocation5 + $0x18] sm:$0x3f] %vm1165_vm8, %v1160_v26  ;;  %v1189_v31 = vld [vmem:[#allocation5 + $0x4] ss:$2 sm:$0xff] }
 0x1ec   : > { %v1186_v30 = vmax.f32 %v1180_v28, %v1183_v29 }
 0x1ee   : > { %v1192_v32 = vmax.f32 %v1186_v30, %v1189_v31 }
 0x1f0   : > { %1197 = vst.msk [vmem:[#allocation6 + $0x2] sm:$0xff] %vm1161_vm6, %v1192_v32 }
 0x1f1   : > { %v1169_v33 = vld [vmem:[#allocation5 + $0x10] ss:$2 sm:$0x1f]  ;;  %v1173_v34 = vld [vmem:[#allocation5 + $0x11] ss:$2 sm:$0x1f] }
 0x1f2   : > { %v1175_v35 = vmax.f32 %v1169_v33, %v1173_v34  ;;  %v1179_v36 = vld [vmem:[#allocation5 + $0x12] ss:$2 sm:$0x1f]  ;;  %v1185_v38 = vld [vmem:[#allocation5 + $0x13] ss:$2 sm:$0x1f] }
 0x1f3   : > { %v1191_v40 = vld [vmem:[#allocation5 + $0x14] ss:$2 sm:$0x1f] }
 0x1f4   : > { %v1181_v37 = vmax.f32 %v1175_v35, %v1179_v36 }
 0x1f6   : > { %v1187_v39 = vmax.f32 %v1181_v37, %v1185_v38 }
 0x1f7   : > { %v1204_v41 = vld [vmem:[#allocation6 + $0x1] sm:$0xff] }
 0x1f8   : > { %v1200_v42 = vld [vmem:[#allocation6] sm:$0xff]  ;;  %v1193_v44 = vmax.f32 %v1187_v39, %v1191_v40  ;;  %1650 = vmatmul.msk.f32.vlgmr.msra.gmra.mxu0 %vm1161_vm6, %v1204_v41  ;;  %v1445_v39 = vld [vmem:[#allocation11 + $0x5] sm:$0x1] }
 0x1f9   : > { %v1267_v43 = vld [vmem:[#allocation6 + $0x2] sm:$0xff]  ;;  %1652 = vmatmul.msk.f32.vlgmr.msrb.gmra.mxu1 %vm1161_vm6, %v1200_v42 }
 0x1fa   : > { %1656 = vmatmul.msk.f32.vlgmr.msrb.gmra.mxu2 %vm1161_vm6, %v1267_v43  ;;  %1199 = vst.msk [vmem:[#allocation6 + $0xa] sm:$0x1f] %vm1198_vm9, %v1193_v44 }
 0x201   : > { %v1205_v45 = vld [vmem:[#allocation6 + $0x9] sm:$0x1f] }
 0x202   : > { %v1201_v7 = vld [vmem:[#allocation6 + $0x8] sm:$0x1f]  ;;  %1651 = vmatmul.msk.f32.vlgmr.msrb.gmra.mxu3 %vm1161_vm6, %v1205_v45 }
 0x203   : > { %v1268_v46 = vld [vmem:[#allocation6 + $0xa] sm:$0x1f]  ;;  %1653 = vmatmul.msk.f32.gmra.mxu1 %vm1161_vm6, %v1201_v7 }
 0x204   : > { %v1339_v47 = vld [vmem:[#allocation6 + $0x4] sm:$0xff]  ;;  %1657 = vmatmul.msk.f32.gmra.mxu2 %vm1161_vm6, %v1268_v46  ;;  %v1340_v49 = vld [vmem:[#allocation6 + $0xc] sm:$0x1f] }
 0x205   : > { %1664 = vmatmul.msk.f32.vlgmr.msrb.gmra.mxu0 %vm1161_vm6, %v1339_v47  ;;  %v1303_v48 = vld [vmem:[#allocation6 + $0x3] sm:$0xff]  ;;  %v1304_v50 = vld [vmem:[#allocation6 + $0xb] sm:$0x1f] }
 0x20a   : > { %1660 = vmatmul.msk.f32.vlgmr.msra.gmra.mxu3 %vm1161_vm6, %v1303_v48 }
 0x20b   : > { %1666 = vmatmul.msk.f32.vlgmr.msra.gmra.mxu1 %vm1161_vm6, %v1192_v32 }
 0x20d   : > { %1665 = vmatmul.msk.f32.gmra.mxu0 %vm1161_vm6, %v1340_v49 }
 0x212   : > { %1661 = vmatmul.msk.f32.gmra.mxu3 %vm1161_vm6, %v1304_v50 }
 0x213   : > { %1667 = vmatmul.msk.f32.gmra.mxu1 %vm1161_vm6, %v1193_v44 }
 0x275   : > { %v1232_v55 = vpop.f32.mrf.mxu0 }
 0x276   : > { %v1261_v51 = vpop.f32.mrf.mxu1 }
 0x277   : > { %v1262_v0 = vadd.f32 %v1261_v51, %v1232_v55 }
 0x27d   : > { %v1295_v59 = vpop.f32.mrf.mxu2 }
 0x27e   : > { %v1301_v58 = vadd.f32 %v1295_v59, %v1262_v0 }
 0x280   : > { %v1264_v13 = vpop.f32.mrf.mxu1 }
 0x282   : > { %v1367_v60 = vpop.f32.mrf.mxu0 }
 0x285   : > { %v1235_v57 = vpop.f32.mrf.mxu3 }
 0x286   : > { %v1265_v5 = vadd.f32 %v1264_v13, %v1235_v57 }
 0x287   : > { %v1298_v10 = vpop.f32.mrf.mxu2 }
 0x288   : > { %v1408_v2 = vpop.f32.mrf.mxu1  ;;  %v1302_v63 = vadd.f32 %v1298_v10, %v1265_v5 }
 0x289   : > { %v1409_v11 = vadd.f32 %v1738_v6, %v1408_v2 }
 0x28a   : > { %v1370_v17 = vpop.f32.mrf.mxu0 }
 0x28d   : > { %v1331_v61 = vpop.f32.mrf.mxu3 }
 0x28e   : > { %v1337_v62 = vadd.f32 %v1331_v61, %v1301_v58 }
 0x290   : > { %v1373_v8 = vadd.f32 %v1367_v60, %v1337_v62  ;;  %v1411_v19 = vpop.f32.mrf.mxu1 }
 0x291   : > { %v1412_v20 = vadd.f32 %v1738_v6, %v1411_v19 }
 0x292   : > { %v1377_v9 = vadd.f32 %v1739_v1, %v1373_v8 }
 0x294   : > { %v1379_v12 = vmax.f32 %v1377_v9, 0.0 }
 0x295   : > { %v1334_v14 = vpop.f32.mrf.mxu3 }
 0x296   : > { %v1414_v15 = vadd.f32 %v1409_v11, %v1379_v12  ;;  %v1338_v16 = vadd.f32 %v1334_v14, %v1302_v63 }
 0x298   : > { %v1374_v18 = vadd.f32 %v1370_v17, %v1338_v16  ;;  %1417 = vst.msk [vmem:[#allocation7] sm:$0xff] %vm1416_vm10, %v1414_v15 }
 0x29a   : > { %v1378_v4 = vadd.f32 %v1739_v1, %v1374_v18 }
 0x29c   : > { %v1380_v3 = vmax.f32 %v1378_v4, 0.0 }
 0x29e   : > { %v1415_v21 = vadd.f32 %v1412_v20, %v1380_v3 }
 0x2a0   : > { %1419 = vst.msk [vmem:[#allocation7 + $0x8] sm:$0x1f] %vm1418_vm11, %v1415_v21 }
 0x2a7   : > { %v1420_v22 = vld [vmem:[#allocation7] ss:$2 sm:$0x1f]  ;;  %v1422_v23 = vld [vmem:[#allocation7 + $0x1] ss:$2 sm:$0x1f] }
 0x2a8   : > { %v1423_v24 = vmax.f32 %v1420_v22, %v1422_v23  ;;  %v1425_v25 = vld [vmem:[#allocation7 + $0x2] ss:$2 sm:$0x1f]  ;;  %v1428_v27 = vld [vmem:[#allocation7 + $0x3] ss:$2 sm:$0x1f] }
 0x2a9   : > { %v1431_v29 = vld [vmem:[#allocation7 + $0x4] ss:$2 sm:$0x1f] }
 0x2aa   : > { %v1426_v26 = vmax.f32 %v1423_v24, %v1425_v25 }
 0x2ac   : > { %v1429_v28 = vmax.f32 %v1426_v26, %v1428_v27 }
 0x2ae   : > { %v1432_v30 = vmax.f32 %v1429_v28, %v1431_v29 }
 0x2b0   : > { %v1433_v31 = vsel %vm1418_vm11, %v1432_v30, 0.0 }
 0x2b1   : > { %v1434_v32 = vrot.slane %v1433_v31, 4 }
 0x2b3   : > { %v1435_v33 = vadd.f32 %v1434_v32, %v1433_v31 }
 0x2b5   : > { %v1436_v34 = vrot.slane %v1435_v33, 2 }
 0x2b7   : > { %v1437_v35 = vadd.f32 %v1436_v34, %v1435_v33 }
 0x2b9   : > { %v1438_v36 = vrot.slane %v1437_v35, 1 }
 0x2bb   : > { %v1439_v37 = vadd.f32 %v1438_v36, %v1437_v35 }
 0x2bd   : > { %v1440_v38 = vmul.f32 0.2, %v1439_v37 }
 0x2bf   : > { %1668 = vmatmul.msk.f32.vlgmr.msra.gmra.mxu2 %vm1416_vm10, %v1440_v38 }
 0x342   : > { %v1466_v40 = vpop.f32.mrf.mxu2 }
 0x343   : > { %v1467_v41 = vadd.f32 %v1466_v40, %v1445_v39 }
 0x345   : > { %1470 = vst.msk [vmem:[%s327_s24] sm:$0x1] %vm1469_vm12, %v1467_v41 }
 0x346   : > { %1827 = shalt.err (!%p1824_p8)
}
 0x347   : > { %1682 = dma.vmem_to_hbm [thread:$0]  (%p1958_p5), %s1483_s25, 16, %s1485_s26, %s1472_s10  }
 0x348 PF: > { %p1699_p9 = scmp.ge.s32.totalorder %s1870_s30, 2  ;;  %s1496_s20 = sand.u32 1, %s1858_s27  }
 0x349   : > { %s1497_s22 = scalar_lea.sflag [#allocation10], %s1496_s20 }
 0x34a   : > { %p1692_p10 = pnand %p1699_p9, %p1962_p6 }
 0x34c   : > { %p1693_p11 = pneg %p1692_p10 }
 0x34e   : > { %1853 = dma.done.wait (%p1693_p11), %s1497_s22, 16  }
 0x34f   : > { %1855 = vsyncadd (%p1693_p11), %s1497_s22, 4294967280  ;;  %p20_p12 = scmp.ge.s32.totalorder %s1945_s11, 4   ;;  %s2277_s27 = smov %s1862_s28 }
 0x350   : > { %s2278_s28 = smov %s1866_s29  ;;  %s2279_s29 = smov %s1956_s14 }
 0x351   : > { %s2280_s30 = smov %s1945_s11  ;;  %22 = sbr.rel (!%p20_p12) target bundleno = 5 (0x5), region = 140 }
 0x356   :  { %1502 = vsyncpa [#allocation9], 1 }
 0x357   :  { %1504 = vsyncpa [#allocation9 + $0x1], 1 }
 0x358   :  { %1505 = vsyncpa [#allocation12], 1 }
 0x359   :  { %1506 = vsyncpa [#allocation10], 1 }
 0x35a   :  { %1508 = vsyncpa [#allocation10 + $0x1], 1 }

</bundles_post_ra>
